<compile_context>
chip_gen: v7x
topology: tpu7x:2x2x1
jax: 0.10.0
libtpu: 0.0.40
codegen_flags: <defaults>
</compile_context>

<pallas_src>
import jax
import jax.numpy as jnp
from jax.experimental import pallas as pl
from jax.experimental.pallas import tpu as pltpu

LANE = 128


def _round_up(x, m):
    return (x + m - 1) // m * m


# ---------------- fused per-layer kernel ----------------
def rgcn_layer_kernel(a_ref, feat_ref, w_ref, bias_ref, out_ref, acc_ref):
    """out = relu( sum_r (A'_r @ feat) @ W'_r + bias ), K-tiled over src nodes.

    a_ref:    (R+1, tm, tk)   bf16  adjacency rows of this dst tile / K chunk
    feat_ref: (tk, Dinp)      bf16  source features of this K chunk
    w_ref:    (R+1, Dinp, Dp) bf16  basis-expanded weights (+ W_loop last)
    bias_ref: (1, Dp)         f32
    acc_ref:  (tm, Dp)        f32   VMEM accumulator (resident across K)
    """
    k = pl.program_id(1)

    @pl.when(k == 0)
    def _init():
        acc_ref[...] = jnp.zeros_like(acc_ref)

    nrel = a_ref.shape[0]
    part = jnp.zeros(acc_ref.shape, jnp.float32)
    for r in range(nrel):  # R+1 is tiny -> static unroll
        z = jnp.dot(a_ref[r], feat_ref[...], preferred_element_type=jnp.float32)
        part = part + jnp.dot(z.astype(w_ref.dtype), w_ref[r],
                              preferred_element_type=jnp.float32)
    acc_ref[...] += part

    @pl.when(k == pl.num_programs(1) - 1)
    def _finalize():
        out_ref[...] = jnp.maximum(acc_ref[...] + bias_ref[...], 0.0
                                   ).astype(out_ref.dtype)


def rel_graph_conv_relu(a_pad, feat_pad, V, comp, w_loop, bias, *, tm, tk,
                        out_dtype):
    """One RelGraphConv (basis, sum agg, self-loop, bias) + ReLU, fully fused."""
    nrel1, Npad, _ = a_pad.shape
    Din, Dout = w_loop.shape
    Dinp = feat_pad.shape[1]
    Dp = _round_up(Dout, LANE)

    # Basis decomposition W_r = sum_b comp[r,b] V[b]; self-loop appended as an
    # extra relation; zero-pad to lane-dense (Dinp, Dp).  Tiny plain-JAX glue.
    W = jnp.einsum("rb,bio->rio", comp, V)
    W = jnp.concatenate([W, w_loop[None]], axis=0)
    W = jnp.pad(W, ((0, 0), (0, Dinp - Din), (0, Dp - Dout))).astype(jnp.bfloat16)
    b2 = jnp.pad(bias, (0, Dp - Dout)).reshape(1, Dp).astype(jnp.float32)

    grid = (Npad // tm, Npad // tk)  # (dst tiles, src/K tiles) — K last
    return pl.pallas_call(
        rgcn_layer_kernel,
        out_shape=jax.ShapeDtypeStruct((Npad, Dp), out_dtype),
        grid_spec=pltpu.PrefetchScalarGridSpec(
            num_scalar_prefetch=0,
            grid=grid,
            in_specs=[
                pl.BlockSpec((nrel1, tm, tk), lambda i, k: (0, i, k)),   # A' rows
                pl.BlockSpec((tk, Dinp), lambda i, k: (k, 0)),           # src feats
                pl.BlockSpec((nrel1, Dinp, Dp), lambda i, k: (0, 0, 0)), # weights
                pl.BlockSpec((1, Dp), lambda i, k: (0, 0)),              # bias
            ],
            out_specs=pl.BlockSpec((tm, Dp), lambda i, k: (i, 0)),
            scratch_shapes=[pltpu.VMEM((tm, Dp), jnp.float32)],
        ),
        compiler_params=pltpu.CompilerParams(
            dimension_semantics=("parallel", "arbitrary"),
            vmem_limit_bytes=32 * 1024 * 1024,
        ),
    )(a_pad, feat_pad, W, b2)


def rgcn_forward(A, feat, params):
    """RGCN.forward: layer1 -> relu -> layer2 -> relu (ReLU fused in kernel)."""
    R, N, _ = A.shape
    Din = feat.shape[1]

    # ----- tiling: lane-dense src axis, >=2 dst tiles, tm<=128 (v5e VMEM) -----
    Npad = _round_up(max(N, 16), LANE)
    tk = Npad if Npad <= 512 else 512
    Npad = _round_up(Npad, tk)
    tm = LANE if Npad >= 2 * LANE else Npad // 2   # always >= 2 dst-tile steps

    # A' = [A; I]: self-loop folded in as an extra relation. bf16 is lossless
    # for small integer edge multiplicities (0/1 adjacency in this example).
    a_full = jnp.concatenate([A, jnp.eye(N, dtype=A.dtype)[None]], axis=0)
    a_pad = jnp.zeros((R + 1, Npad, Npad), jnp.bfloat16)
    a_pad = a_pad.at[:, :N, :N].set(a_full.astype(jnp.bfloat16))

    Dinp = _round_up(Din, LANE)
    feat_pad = jnp.zeros((Npad, Dinp), jnp.bfloat16)
    feat_pad = feat_pad.at[:N, :Din].set(feat.astype(jnp.bfloat16))

    # layer 1 -> relu, bf16 output fed to layer 2 directly (padded rows/cols
    # of h only ever multiply zero entries of A' / padded-zero rows of W2).
    h = rel_graph_conv_relu(a_pad, feat_pad, params["V1"], params["comp1"],
                            params["loop1"], params["bias1"],
                            tm=tm, tk=tk, out_dtype=jnp.bfloat16)
    # layer 2 -> relu, final f32 output
    out = rel_graph_conv_relu(a_pad, h, params["V2"], params["comp2"],
                              params["loop2"], params["bias2"],
                              tm=tm, tk=tk, out_dtype=jnp.float32)
    out_dim = params["V2"].shape[2]
    return out[:N, :out_dim]


# ---------------- pure-JAX references ----------------
def _reference(A, feat, params, *, quantize_bf16):
    """quantize_bf16=True mirrors the kernel's bf16 operand quantization
    (f32 accumulation); False is the exact f32 semantics of the PyTorch module."""
    N = A.shape[1]
    cast = (lambda x: x.astype(jnp.bfloat16)) if quantize_bf16 else (lambda x: x)

    def layer(x, V, comp, wl, b, last):
        W = jnp.einsum("rb,bio->rio", comp, V)
        Wf = jnp.concatenate([W, wl[None]], axis=0)
        Af = jnp.concatenate([A, jnp.eye(N, dtype=A.dtype)[None]], axis=0)
        z = jnp.einsum("rvu,ud->rvd", cast(Af), cast(x),
                       preferred_element_type=jnp.float32)
        if quantize_bf16:
            z = z.astype(jnp.bfloat16)
        out = jnp.einsum("rvd,rdo->vo", z, cast(Wf),
                         preferred_element_type=jnp.float32)
        out = jnp.maximum(out + b, 0.0)
        if quantize_bf16 and not last:
            out = out.astype(jnp.bfloat16)
        return out

    h = layer(feat, params["V1"], params["comp1"], params["loop1"],
              params["bias1"], last=False)
    return layer(h, params["V2"], params["comp2"], params["loop2"],
                 params["bias2"], last=True)


if __name__ == "__main__":
    # num_nodes = 16 (layer1 in_dim == num_nodes, identity node features),
    # h_dim = 64 (== layer1 out_dim so the forward chains), layer2 out = 32,
    # num_rels = 3, num_bases = num_rels.
    num_nodes, h_dim, out2, num_rels = 16, 64, 32, 3
    num_edges = 40

    key = jax.random.PRNGKey(0)
    ks = jax.random.split(key, 10)

    # graph: random typed edges, densified into per-relation adjacency
    src = jax.random.randint(ks[0], (num_edges,), 0, num_nodes)
    dst = jax.random.randint(ks[1], (num_edges,), 0, num_nodes)
    etypes = jax.random.randint(ks[2], (num_edges,), 0, num_rels)
    A = jnp.zeros((num_rels, num_nodes, num_nodes), jnp.float32)
    A = A.at[etypes, dst, src].add(1.0)

    # node features: one-hot / identity (standard for this RGCN example)
    feat = jnp.eye(num_nodes, dtype=jnp.float32)

    def init(k, shape, scale=0.1):
        return scale * jax.random.normal(k, shape, jnp.float32)

    params = {
        # layer1: RelGraphConv(num_nodes, 64, num_rels, basis, num_bases=num_rels)
        "V1": init(ks[3], (num_rels, num_nodes, 64)),
        "comp1": init(ks[4], (num_rels, num_rels), 1.0),
        "loop1": init(ks[5], (num_nodes, 64)),
        "bias1": jnp.zeros((64,), jnp.float32),
        # layer2: RelGraphConv(h_dim, 32, num_rels, basis, num_bases=num_rels)
        "V2": init(ks[6], (num_rels, h_dim, out2)),
        "comp2": init(ks[7], (num_rels, num_rels), 1.0),
        "loop2": init(ks[8], (h_dim, out2)),
        "bias2": jnp.zeros((out2,), jnp.float32),
    }

    out = jax.block_until_ready(jax.jit(rgcn_forward)(A, feat, params))
    assert out.shape == (num_nodes, out2), out.shape

    # tight check vs a reference using the same bf16 operand quantization
    ref_q = _reference(A, feat, params, quantize_bf16=True)
    assert jnp.allclose(out, ref_q, rtol=2e-2, atol=2e-2), \
        "mismatch vs bf16-matched reference"

    # loose check vs the exact f32 semantics of the original module
    ref_f32 = _reference(A, feat, params, quantize_bf16=False)
    err = jnp.max(jnp.abs(out - ref_f32))
    assert err <= 5e-2 * (1.0 + jnp.max(jnp.abs(ref_f32))), f"f32 drift {err}"

    print("KERNEL_OK")
</pallas_src>

<mosaic_0001>
module attributes {stable_mosaic.version = 11 : i64} {
  func.func @rgcn_layer_kernel(%arg0: i32, %arg1: i32, %arg2: memref<4x64x128xbf16, #tpu.memory_space<vmem>>, %arg3: memref<128x128xbf16, #tpu.memory_space<vmem>>, %arg4: memref<4x128x128xbf16, #tpu.memory_space<vmem>>, %arg5: memref<1x128xf32, #tpu.memory_space<vmem>>, %arg6: memref<64x128xbf16, #tpu.memory_space<vmem>>, %arg7: memref<64x128xf32, #tpu.memory_space<vmem>>) attributes {dimension_semantics = [#tpu.dimension_semantics<parallel>, #tpu.dimension_semantics<arbitrary>], iteration_bounds = array<i64: 2, 1>, scalar_prefetch = 0 : i64, scratch_operands = 1 : i64, tpu.core_type = #tpu.core_type<tc>, window_params = [{transform_indices = @transform_0, window_bounds = array<i64: 4, 64, 128>}, {transform_indices = @transform_1, window_bounds = array<i64: 128, 128>}, {pipeline_mode = #tpu.pipeline_mode<synchronous>, transform_indices = @transform_2, window_bounds = array<i64: 4, 128, 128>}, {pipeline_mode = #tpu.pipeline_mode<synchronous>, transform_indices = @transform_3, window_bounds = array<i64: 1, 128>}, {transform_indices = @transform_4, window_bounds = array<i64: 64, 128>}]} {
    %c0_i32 = arith.constant 0 : i32
    %0 = arith.cmpi eq, %arg1, %c0_i32 : i32
    %1 = arith.extui %0 : i1 to i32
    %c0_i32_0 = arith.constant 0 : i32
    %2 = arith.cmpi ne, %1, %c0_i32_0 : i32
    scf.if %2 {
      %cst_43 = arith.constant 0.000000e+00 : f32
      %46 = vector.broadcast %cst_43 : f32 to vector<64x128xf32>
      %c0_44 = arith.constant 0 : index
      %c0_45 = arith.constant 0 : index
      %47 = vector.load %arg7[%c0_44, %c0_45] : memref<64x128xf32, #tpu.memory_space<vmem>>, vector<64x128xf32>
      tpu.vector_store %arg7[%c0_44, %c0_45], %46 {strides = array<i32>} : memref<64x128xf32, #tpu.memory_space<vmem>>, vector<64x128xf32>,
    } else {
    }
    %cst = arith.constant 0.000000e+00 : f32
    %3 = vector.broadcast %cst : f32 to vector<64x128xf32>
    %c0 = arith.constant 0 : index
    %c0_1 = arith.constant 0 : index
    %c0_2 = arith.constant 0 : index
    %4 = vector.load %arg2[%c0, %c0_1, %c0_2] : memref<4x64x128xbf16, #tpu.memory_space<vmem>>, vector<1x64x128xbf16>
    %5 = vector.shape_cast %4 : vector<1x64x128xbf16> to vector<64x128xbf16>
    %c0_3 = arith.constant 0 : index
    %c0_4 = arith.constant 0 : index
    %6 = vector.load %arg3[%c0_3, %c0_4] : memref<128x128xbf16, #tpu.memory_space<vmem>>, vector<128x128xbf16>
    %cst_5 = arith.constant dense<0.000000e+00> : vector<64x128xf32>
    %7 = tpu.matmul %5, %6, %cst_5 {dimension_numbers = #tpu.dot_dimension_numbers<[1], [0], [0], [1], [0, 0, 1, 1], [], []>} : vector<64x128xbf16>, vector<128x128xbf16>, vector<64x128xf32> -> vector<64x128xf32>
    %8 = arith.truncf %7 : vector<64x128xf32> to vector<64x128xbf16>
    %c0_6 = arith.constant 0 : index
    %c0_7 = arith.constant 0 : index
    %c0_8 = arith.constant 0 : index
    %9 = vector.load %arg4[%c0_6, %c0_7, %c0_8] : memref<4x128x128xbf16, #tpu.memory_space<vmem>>, vector<1x128x128xbf16>
    %10 = vector.shape_cast %9 : vector<1x128x128xbf16> to vector<128x128xbf16>
    %cst_9 = arith.constant dense<0.000000e+00> : vector<64x128xf32>
    %11 = tpu.matmul %8, %10, %cst_9 {dimension_numbers = #tpu.dot_dimension_numbers<[1], [0], [0], [1], [0, 0, 1, 1], [], []>} : vector<64x128xbf16>, vector<128x128xbf16>, vector<64x128xf32> -> vector<64x128xf32>
    %12 = arith.addf %3, %11 : vector<64x128xf32>
    %c1 = arith.constant 1 : index
    %c0_10 = arith.constant 0 : index
    %c0_11 = arith.constant 0 : index
    %13 = vector.load %arg2[%c1, %c0_10, %c0_11] : memref<4x64x128xbf16, #tpu.memory_space<vmem>>, vector<1x64x128xbf16>
    %14 = vector.shape_cast %13 : vector<1x64x128xbf16> to vector<64x128xbf16>
    %c0_12 = arith.constant 0 : index
    %c0_13 = arith.constant 0 : index
    %15 = vector.load %arg3[%c0_12, %c0_13] : memref<128x128xbf16, #tpu.memory_space<vmem>>, vector<128x128xbf16>
    %cst_14 = arith.constant dense<0.000000e+00> : vector<64x128xf32>
    %16 = tpu.matmul %14, %15, %cst_14 {dimension_numbers = #tpu.dot_dimension_numbers<[1], [0], [0], [1], [0, 0, 1, 1], [], []>} : vector<64x128xbf16>, vector<128x128xbf16>, vector<64x128xf32> -> vector<64x128xf32>
    %17 = arith.truncf %16 : vector<64x128xf32> to vector<64x128xbf16>
    %c1_15 = arith.constant 1 : index
    %c0_16 = arith.constant 0 : index
    %c0_17 = arith.constant 0 : index
    %18 = vector.load %arg4[%c1_15, %c0_16, %c0_17] : memref<4x128x128xbf16, #tpu.memory_space<vmem>>, vector<1x128x128xbf16>
    %19 = vector.shape_cast %18 : vector<1x128x128xbf16> to vector<128x128xbf16>
    %cst_18 = arith.constant dense<0.000000e+00> : vector<64x128xf32>
    %20 = tpu.matmul %17, %19, %cst_18 {dimension_numbers = #tpu.dot_dimension_numbers<[1], [0], [0], [1], [0, 0, 1, 1], [], []>} : vector<64x128xbf16>, vector<128x128xbf16>, vector<64x128xf32> -> vector<64x128xf32>
    %21 = arith.addf %12, %20 : vector<64x128xf32>
    %c2 = arith.constant 2 : index
    %c0_19 = arith.constant 0 : index
    %c0_20 = arith.constant 0 : index
    %22 = vector.load %arg2[%c2, %c0_19, %c0_20] : memref<4x64x128xbf16, #tpu.memory_space<vmem>>, vector<1x64x128xbf16>
    %23 = vector.shape_cast %22 : vector<1x64x128xbf16> to vector<64x128xbf16>
    %c0_21 = arith.constant 0 : index
    %c0_22 = arith.constant 0 : index
    %24 = vector.load %arg3[%c0_21, %c0_22] : memref<128x128xbf16, #tpu.memory_space<vmem>>, vector<128x128xbf16>
    %cst_23 = arith.constant dense<0.000000e+00> : vector<64x128xf32>
    %25 = tpu.matmul %23, %24, %cst_23 {dimension_numbers = #tpu.dot_dimension_numbers<[1], [0], [0], [1], [0, 0, 1, 1], [], []>} : vector<64x128xbf16>, vector<128x128xbf16>, vector<64x128xf32> -> vector<64x128xf32>
    %26 = arith.truncf %25 : vector<64x128xf32> to vector<64x128xbf16>
    %c2_24 = arith.constant 2 : index
    %c0_25 = arith.constant 0 : index
    %c0_26 = arith.constant 0 : index
    %27 = vector.load %arg4[%c2_24, %c0_25, %c0_26] : memref<4x128x128xbf16, #tpu.memory_space<vmem>>, vector<1x128x128xbf16>
    %28 = vector.shape_cast %27 : vector<1x128x128xbf16> to vector<128x128xbf16>
    %cst_27 = arith.constant dense<0.000000e+00> : vector<64x128xf32>
    %29 = tpu.matmul %26, %28, %cst_27 {dimension_numbers = #tpu.dot_dimension_numbers<[1], [0], [0], [1], [0, 0, 1, 1], [], []>} : vector<64x128xbf16>, vector<128x128xbf16>, vector<64x128xf32> -> vector<64x128xf32>
    %30 = arith.addf %21, %29 : vector<64x128xf32>
    %c3 = arith.constant 3 : index
    %c0_28 = arith.constant 0 : index
    %c0_29 = arith.constant 0 : index
    %31 = vector.load %arg2[%c3, %c0_28, %c0_29] : memref<4x64x128xbf16, #tpu.memory_space<vmem>>, vector<1x64x128xbf16>
    %32 = vector.shape_cast %31 : vector<1x64x128xbf16> to vector<64x128xbf16>
    %c0_30 = arith.constant 0 : index
    %c0_31 = arith.constant 0 : index
    %33 = vector.load %arg3[%c0_30, %c0_31] : memref<128x128xbf16, #tpu.memory_space<vmem>>, vector<128x128xbf16>
    %cst_32 = arith.constant dense<0.000000e+00> : vector<64x128xf32>
    %34 = tpu.matmul %32, %33, %cst_32 {dimension_numbers = #tpu.dot_dimension_numbers<[1], [0], [0], [1], [0, 0, 1, 1], [], []>} : vector<64x128xbf16>, vector<128x128xbf16>, vector<64x128xf32> -> vector<64x128xf32>
    %35 = arith.truncf %34 : vector<64x128xf32> to vector<64x128xbf16>
    %c3_33 = arith.constant 3 : index
    %c0_34 = arith.constant 0 : index
    %c0_35 = arith.constant 0 : index
    %36 = vector.load %arg4[%c3_33, %c0_34, %c0_35] : memref<4x128x128xbf16, #tpu.memory_space<vmem>>, vector<1x128x128xbf16>
    %37 = vector.shape_cast %36 : vector<1x128x128xbf16> to vector<128x128xbf16>
    %cst_36 = arith.constant dense<0.000000e+00> : vector<64x128xf32>
    %38 = tpu.matmul %35, %37, %cst_36 {dimension_numbers = #tpu.dot_dimension_numbers<[1], [0], [0], [1], [0, 0, 1, 1], [], []>} : vector<64x128xbf16>, vector<128x128xbf16>, vector<64x128xf32> -> vector<64x128xf32>
    %39 = arith.addf %30, %38 : vector<64x128xf32>
    %c0_37 = arith.constant 0 : index
    %c0_38 = arith.constant 0 : index
    %40 = vector.load %arg7[%c0_37, %c0_38] : memref<64x128xf32, #tpu.memory_space<vmem>>, vector<64x128xf32>
    %41 = arith.addf %40, %39 : vector<64x128xf32>
    %c0_39 = arith.constant 0 : index
    %c0_40 = arith.constant 0 : index
    %42 = vector.load %arg7[%c0_39, %c0_40] : memref<64x128xf32, #tpu.memory_space<vmem>>, vector<64x128xf32>
    tpu.vector_store %arg7[%c0_39, %c0_40], %41 {strides = array<i32>} : memref<64x128xf32, #tpu.memory_space<vmem>>, vector<64x128xf32>,
    %c0_i32_41 = arith.constant 0 : i32
    %43 = arith.cmpi eq, %arg1, %c0_i32_41 : i32
    %44 = arith.extui %43 : i1 to i32
    %c0_i32_42 = arith.constant 0 : i32
    %45 = arith.cmpi ne, %44, %c0_i32_42 : i32
    scf.if %45 {
      %c0_43 = arith.constant 0 : index
      %c0_44 = arith.constant 0 : index
      %46 = vector.load %arg7[%c0_43, %c0_44] : memref<64x128xf32, #tpu.memory_space<vmem>>, vector<64x128xf32>
      %c0_45 = arith.constant 0 : index
      %c0_46 = arith.constant 0 : index
      %47 = vector.load %arg5[%c0_45, %c0_46] : memref<1x128xf32, #tpu.memory_space<vmem>>, vector<1x128xf32>
      %48 = vector.broadcast %47 : vector<1x128xf32> to vector<64x128xf32>
      %49 = arith.addf %46, %48 : vector<64x128xf32>
      %cst_47 = arith.constant 0.000000e+00 : f32
      %50 = vector.broadcast %cst_47 : f32 to vector<64x128xf32>
      %51 = arith.maximumf %49, %50 : vector<64x128xf32>
      %52 = arith.truncf %51 : vector<64x128xf32> to vector<64x128xbf16>
      %c0_48 = arith.constant 0 : index
      %c0_49 = arith.constant 0 : index
      %53 = vector.load %arg6[%c0_48, %c0_49] : memref<64x128xbf16, #tpu.memory_space<vmem>>, vector<64x128xbf16>
      tpu.vector_store %arg6[%c0_48, %c0_49], %52 {strides = array<i32>} : memref<64x128xbf16, #tpu.memory_space<vmem>>, vector<64x128xbf16>,
    } else {
    }
    return
  }
  func.func @transform_0(%arg0: i32, %arg1: i32) -> (i32, i32, i32) {
    %c0_i32 = arith.constant 0 : i32
    %c0_i32_0 = arith.constant 0 : i32
    return %c0_i32, %arg0, %arg1 : i32, i32, i32
  }
  func.func @transform_1(%arg0: i32, %arg1: i32) -> (i32, i32) {
    %c0_i32 = arith.constant 0 : i32
    %c0_i32_0 = arith.constant 0 : i32
    return %arg1, %c0_i32 : i32, i32
  }
  func.func @transform_2(%arg0: i32, %arg1: i32) -> (i32, i32, i32) {
    %c0_i32 = arith.constant 0 : i32
    %c0_i32_0 = arith.constant 0 : i32
    %c0_i32_1 = arith.constant 0 : i32
    %c0_i32_2 = arith.constant 0 : i32
    return %c0_i32, %c0_i32_0, %c0_i32_1 : i32, i32, i32
  }
  func.func @transform_3(%arg0: i32, %arg1: i32) -> (i32, i32) {
    %c0_i32 = arith.constant 0 : i32
    %c0_i32_0 = arith.constant 0 : i32
    %c0_i32_1 = arith.constant 0 : i32
    return %c0_i32, %c0_i32_0 : i32, i32
  }
  func.func @transform_4(%arg0: i32, %arg1: i32) -> (i32, i32) {
    %c0_i32 = arith.constant 0 : i32
    %c0_i32_0 = arith.constant 0 : i32
    return %arg0, %c0_i32 : i32, i32
  }
}

module attributes {stable_mosaic.version = 11 : i64} {
  func.func @rgcn_layer_kernel(%arg0: i32, %arg1: i32, %arg2: memref<4x64x128xbf16, #tpu.memory_space<vmem>>, %arg3: memref<128x128xbf16, #tpu.memory_space<vmem>>, %arg4: memref<4x128x128xbf16, #tpu.memory_space<vmem>>, %arg5: memref<1x128xf32, #tpu.memory_space<vmem>>, %arg6: memref<64x128xf32, #tpu.memory_space<vmem>>, %arg7: memref<64x128xf32, #tpu.memory_space<vmem>>) attributes {dimension_semantics = [#tpu.dimension_semantics<parallel>, #tpu.dimension_semantics<arbitrary>], iteration_bounds = array<i64: 2, 1>, scalar_prefetch = 0 : i64, scratch_operands = 1 : i64, tpu.core_type = #tpu.core_type<tc>, window_params = [{transform_indices = @transform_0, window_bounds = array<i64: 4, 64, 128>}, {transform_indices = @transform_1, window_bounds = array<i64: 128, 128>}, {pipeline_mode = #tpu.pipeline_mode<synchronous>, transform_indices = @transform_2, window_bounds = array<i64: 4, 128, 128>}, {pipeline_mode = #tpu.pipeline_mode<synchronous>, transform_indices = @transform_3, window_bounds = array<i64: 1, 128>}, {transform_indices = @transform_4, window_bounds = array<i64: 64, 128>}]} {
    %c0_i32 = arith.constant 0 : i32
    %0 = arith.cmpi eq, %arg1, %c0_i32 : i32
    %1 = arith.extui %0 : i1 to i32
    %c0_i32_0 = arith.constant 0 : i32
    %2 = arith.cmpi ne, %1, %c0_i32_0 : i32
    scf.if %2 {
      %cst_43 = arith.constant 0.000000e+00 : f32
      %46 = vector.broadcast %cst_43 : f32 to vector<64x128xf32>
      %c0_44 = arith.constant 0 : index
      %c0_45 = arith.constant 0 : index
      %47 = vector.load %arg7[%c0_44, %c0_45] : memref<64x128xf32, #tpu.memory_space<vmem>>, vector<64x128xf32>
      tpu.vector_store %arg7[%c0_44, %c0_45], %46 {strides = array<i32>} : memref<64x128xf32, #tpu.memory_space<vmem>>, vector<64x128xf32>,
    } else {
    }
    %cst = arith.constant 0.000000e+00 : f32
    %3 = vector.broadcast %cst : f32 to vector<64x128xf32>
    %c0 = arith.constant 0 : index
    %c0_1 = arith.constant 0 : index
    %c0_2 = arith.constant 0 : index
    %4 = vector.load %arg2[%c0, %c0_1, %c0_2] : memref<4x64x128xbf16, #tpu.memory_space<vmem>>, vector<1x64x128xbf16>
    %5 = vector.shape_cast %4 : vector<1x64x128xbf16> to vector<64x128xbf16>
    %c0_3 = arith.constant 0 : index
    %c0_4 = arith.constant 0 : index
    %6 = vector.load %arg3[%c0_3, %c0_4] : memref<128x128xbf16, #tpu.memory_space<vmem>>, vector<128x128xbf16>
    %cst_5 = arith.constant dense<0.000000e+00> : vector<64x128xf32>
    %7 = tpu.matmul %5, %6, %cst_5 {dimension_numbers = #tpu.dot_dimension_numbers<[1], [0], [0], [1], [0, 0, 1, 1], [], []>} : vector<64x128xbf16>, vector<128x128xbf16>, vector<64x128xf32> -> vector<64x128xf32>
    %8 = arith.truncf %7 : vector<64x128xf32> to vector<64x128xbf16>
    %c0_6 = arith.constant 0 : index
    %c0_7 = arith.constant 0 : index
    %c0_8 = arith.constant 0 : index
    %9 = vector.load %arg4[%c0_6, %c0_7, %c0_8] : memref<4x128x128xbf16, #tpu.memory_space<vmem>>, vector<1x128x128xbf16>
    %10 = vector.shape_cast %9 : vector<1x128x128xbf16> to vector<128x128xbf16>
    %cst_9 = arith.constant dense<0.000000e+00> : vector<64x128xf32>
    %11 = tpu.matmul %8, %10, %cst_9 {dimension_numbers = #tpu.dot_dimension_numbers<[1], [0], [0], [1], [0, 0, 1, 1], [], []>} : vector<64x128xbf16>, vector<128x128xbf16>, vector<64x128xf32> -> vector<64x128xf32>
    %12 = arith.addf %3, %11 : vector<64x128xf32>
    %c1 = arith.constant 1 : index
    %c0_10 = arith.constant 0 : index
    %c0_11 = arith.constant 0 : index
    %13 = vector.load %arg2[%c1, %c0_10, %c0_11] : memref<4x64x128xbf16, #tpu.memory_space<vmem>>, vector<1x64x128xbf16>
    %14 = vector.shape_cast %13 : vector<1x64x128xbf16> to vector<64x128xbf16>
    %c0_12 = arith.constant 0 : index
    %c0_13 = arith.constant 0 : index
    %15 = vector.load %arg3[%c0_12, %c0_13] : memref<128x128xbf16, #tpu.memory_space<vmem>>, vector<128x128xbf16>
    %cst_14 = arith.constant dense<0.000000e+00> : vector<64x128xf32>
    %16 = tpu.matmul %14, %15, %cst_14 {dimension_numbers = #tpu.dot_dimension_numbers<[1], [0], [0], [1], [0, 0, 1, 1], [], []>} : vector<64x128xbf16>, vector<128x128xbf16>, vector<64x128xf32> -> vector<64x128xf32>
    %17 = arith.truncf %16 : vector<64x128xf32> to vector<64x128xbf16>
    %c1_15 = arith.constant 1 : index
    %c0_16 = arith.constant 0 : index
    %c0_17 = arith.constant 0 : index
    %18 = vector.load %arg4[%c1_15, %c0_16, %c0_17] : memref<4x128x128xbf16, #tpu.memory_space<vmem>>, vector<1x128x128xbf16>
    %19 = vector.shape_cast %18 : vector<1x128x128xbf16> to vector<128x128xbf16>
    %cst_18 = arith.constant dense<0.000000e+00> : vector<64x128xf32>
    %20 = tpu.matmul %17, %19, %cst_18 {dimension_numbers = #tpu.dot_dimension_numbers<[1], [0], [0], [1], [0, 0, 1, 1], [], []>} : vector<64x128xbf16>, vector<128x128xbf16>, vector<64x128xf32> -> vector<64x128xf32>
    %21 = arith.addf %12, %20 : vector<64x128xf32>
    %c2 = arith.constant 2 : index
    %c0_19 = arith.constant 0 : index
    %c0_20 = arith.constant 0 : index
    %22 = vector.load %arg2[%c2, %c0_19, %c0_20] : memref<4x64x128xbf16, #tpu.memory_space<vmem>>, vector<1x64x128xbf16>
    %23 = vector.shape_cast %22 : vector<1x64x128xbf16> to vector<64x128xbf16>
    %c0_21 = arith.constant 0 : index
    %c0_22 = arith.constant 0 : index
    %24 = vector.load %arg3[%c0_21, %c0_22] : memref<128x128xbf16, #tpu.memory_space<vmem>>, vector<128x128xbf16>
    %cst_23 = arith.constant dense<0.000000e+00> : vector<64x128xf32>
    %25 = tpu.matmul %23, %24, %cst_23 {dimension_numbers = #tpu.dot_dimension_numbers<[1], [0], [0], [1], [0, 0, 1, 1], [], []>} : vector<64x128xbf16>, vector<128x128xbf16>, vector<64x128xf32> -> vector<64x128xf32>
    %26 = arith.truncf %25 : vector<64x128xf32> to vector<64x128xbf16>
    %c2_24 = arith.constant 2 : index
    %c0_25 = arith.constant 0 : index
    %c0_26 = arith.constant 0 : index
    %27 = vector.load %arg4[%c2_24, %c0_25, %c0_26] : memref<4x128x128xbf16, #tpu.memory_space<vmem>>, vector<1x128x128xbf16>
    %28 = vector.shape_cast %27 : vector<1x128x128xbf16> to vector<128x128xbf16>
    %cst_27 = arith.constant dense<0.000000e+00> : vector<64x128xf32>
    %29 = tpu.matmul %26, %28, %cst_27 {dimension_numbers = #tpu.dot_dimension_numbers<[1], [0], [0], [1], [0, 0, 1, 1], [], []>} : vector<64x128xbf16>, vector<128x128xbf16>, vector<64x128xf32> -> vector<64x128xf32>
    %30 = arith.addf %21, %29 : vector<64x128xf32>
    %c3 = arith.constant 3 : index
    %c0_28 = arith.constant 0 : index
    %c0_29 = arith.constant 0 : index
    %31 = vector.load %arg2[%c3, %c0_28, %c0_29] : memref<4x64x128xbf16, #tpu.memory_space<vmem>>, vector<1x64x128xbf16>
    %32 = vector.shape_cast %31 : vector<1x64x128xbf16> to vector<64x128xbf16>
    %c0_30 = arith.constant 0 : index
    %c0_31 = arith.constant 0 : index
    %33 = vector.load %arg3[%c0_30, %c0_31] : memref<128x128xbf16, #tpu.memory_space<vmem>>, vector<128x128xbf16>
    %cst_32 = arith.constant dense<0.000000e+00> : vector<64x128xf32>
    %34 = tpu.matmul %32, %33, %cst_32 {dimension_numbers = #tpu.dot_dimension_numbers<[1], [0], [0], [1], [0, 0, 1, 1], [], []>} : vector<64x128xbf16>, vector<128x128xbf16>, vector<64x128xf32> -> vector<64x128xf32>
    %35 = arith.truncf %34 : vector<64x128xf32> to vector<64x128xbf16>
    %c3_33 = arith.constant 3 : index
    %c0_34 = arith.constant 0 : index
    %c0_35 = arith.constant 0 : index
    %36 = vector.load %arg4[%c3_33, %c0_34, %c0_35] : memref<4x128x128xbf16, #tpu.memory_space<vmem>>, vector<1x128x128xbf16>
    %37 = vector.shape_cast %36 : vector<1x128x128xbf16> to vector<128x128xbf16>
    %cst_36 = arith.constant dense<0.000000e+00> : vector<64x128xf32>
    %38 = tpu.matmul %35, %37, %cst_36 {dimension_numbers = #tpu.dot_dimension_numbers<[1], [0], [0], [1], [0, 0, 1, 1], [], []>} : vector<64x128xbf16>, vector<128x128xbf16>, vector<64x128xf32> -> vector<64x128xf32>
    %39 = arith.addf %30, %38 : vector<64x128xf32>
    %c0_37 = arith.constant 0 : index
    %c0_38 = arith.constant 0 : index
    %40 = vector.load %arg7[%c0_37, %c0_38] : memref<64x128xf32, #tpu.memory_space<vmem>>, vector<64x128xf32>
    %41 = arith.addf %40, %39 : vector<64x128xf32>
    %c0_39 = arith.constant 0 : index
    %c0_40 = arith.constant 0 : index
    %42 = vector.load %arg7[%c0_39, %c0_40] : memref<64x128xf32, #tpu.memory_space<vmem>>, vector<64x128xf32>
    tpu.vector_store %arg7[%c0_39, %c0_40], %41 {strides = array<i32>} : memref<64x128xf32, #tpu.memory_space<vmem>>, vector<64x128xf32>,
    %c0_i32_41 = arith.constant 0 : i32
    %43 = arith.cmpi eq, %arg1, %c0_i32_41 : i32
    %44 = arith.extui %43 : i1 to i32
    %c0_i32_42 = arith.constant 0 : i32
    %45 = arith.cmpi ne, %44, %c0_i32_42 : i32
    scf.if %45 {
      %c0_43 = arith.constant 0 : index
      %c0_44 = arith.constant 0 : index
      %46 = vector.load %arg7[%c0_43, %c0_44] : memref<64x128xf32, #tpu.memory_space<vmem>>, vector<64x128xf32>
      %c0_45 = arith.constant 0 : index
      %c0_46 = arith.constant 0 : index
      %47 = vector.load %arg5[%c0_45, %c0_46] : memref<1x128xf32, #tpu.memory_space<vmem>>, vector<1x128xf32>
      %48 = vector.broadcast %47 : vector<1x128xf32> to vector<64x128xf32>
      %49 = arith.addf %46, %48 : vector<64x128xf32>
      %cst_47 = arith.constant 0.000000e+00 : f32
      %50 = vector.broadcast %cst_47 : f32 to vector<64x128xf32>
      %51 = arith.maximumf %49, %50 : vector<64x128xf32>
      %c0_48 = arith.constant 0 : index
      %c0_49 = arith.constant 0 : index
      %52 = vector.load %arg6[%c0_48, %c0_49] : memref<64x128xf32, #tpu.memory_space<vmem>>, vector<64x128xf32>
      tpu.vector_store %arg6[%c0_48, %c0_49], %51 {strides = array<i32>} : memref<64x128xf32, #tpu.memory_space<vmem>>, vector<64x128xf32>,
    } else {
    }
    return
  }
  func.func @transform_0(%arg0: i32, %arg1: i32) -> (i32, i32, i32) {
    %c0_i32 = arith.constant 0 : i32
    %c0_i32_0 = arith.constant 0 : i32
    return %c0_i32, %arg0, %arg1 : i32, i32, i32
  }
  func.func @transform_1(%arg0: i32, %arg1: i32) -> (i32, i32) {
    %c0_i32 = arith.constant 0 : i32
    %c0_i32_0 = arith.constant 0 : i32
    return %arg1, %c0_i32 : i32, i32
  }
  func.func @transform_2(%arg0: i32, %arg1: i32) -> (i32, i32, i32) {
    %c0_i32 = arith.constant 0 : i32
    %c0_i32_0 = arith.constant 0 : i32
    %c0_i32_1 = arith.constant 0 : i32
    %c0_i32_2 = arith.constant 0 : i32
    return %c0_i32, %c0_i32_0, %c0_i32_1 : i32, i32, i32
  }
  func.func @transform_3(%arg0: i32, %arg1: i32) -> (i32, i32) {
    %c0_i32 = arith.constant 0 : i32
    %c0_i32_0 = arith.constant 0 : i32
    %c0_i32_1 = arith.constant 0 : i32
    return %c0_i32, %c0_i32_0 : i32, i32
  }
  func.func @transform_4(%arg0: i32, %arg1: i32) -> (i32, i32) {
    %c0_i32 = arith.constant 0 : i32
    %c0_i32_0 = arith.constant 0 : i32
    return %arg0, %c0_i32 : i32, i32
  }
}

</mosaic_0001>

<bundles_post_ra>
// kernel: rgcn_forward.3
= control target key start
LH: loop header
LB: loop body
LE: loop exit
PB: predicated region body
PF: predicated region fallthrough
CT: control target
= control target key end

     0   :  { %s2193_s15 = smov 0   ;;  %s2195_s16 = smov 0   ;;  %s2506_s0 = inlined_call_operand.vmem [shape: bf16[4,128,128], index: 0, kind: input, shape index: {}]   ;;  %s2507_s1 = inlined_call_operand.vmem [shape: bf16[128,128], index: 1, kind: input, shape index: {}]   ;;  %s2508_s2 = inlined_call_operand.vmem [shape: bf16[4,128,128], index: 2, kind: input, shape index: {}]   ;;  %s2509_s3 = inlined_call_operand.vmem [shape: f32[1,128], index: 3, kind: input, shape index: {}]   ;;  %s2510_s4 = inlined_call_operand.vmem [shape: f32[128,128], index: 4, kind: output, shape index: {}]  }
   0x1   :  { %s2197_s17 = smov 0   ;;  %s2199_s18 = smov 0  }
   0x2   :  { %s2201_s19 = smov 0  }
   0x3 LB: > { %s26_s20 = sadd.s32 1, %s2162_s18  ;;  %p42_p1 = scmp.ne.s32.totalorder %s2154_s16, %s2150_s15  ;;  %s2166_s19 = sphi %s2201_s19, %s14_s19   ;;  %s2162_s18 = sphi %s2199_s18, %s2514_s18   ;;  %s2158_s17 = sphi %s2197_s17, %s2513_s17   ;;  %s2154_s16 = sphi %s2195_s16, %s2512_s16   ;;  %s2150_s15 = sphi %s2193_s15, %s2511_s15  }
   0x4   : > { %p28_p0 = scmp.ge.s32.totalorder %s26_s20, 2  ;;  %p43_p2 = scmp.eq.s32.totalorder %s2166_s19, 0 }
   0x5   : > { %s35_s22 = sadd.s32 1, %s2154_s16  ;;  %p1580_p5 = scmp.ge.s32.totalorder %s2166_s19, 2 }
   0x6   : > { %s2516_s20 = smov (%p28_p0, %s26_s20), 0  ;;  %p44_p3 = por %p43_p2, %p42_p1 }
   0x7   : > { %s30_s21 = ssub.s32 %s2162_s18, %s2516_s20  ;;  %177 = sbr.rel (%p1580_p5) target bundleno = 26 (0x1a), region = 28 }
   0x8   : > { %p33_p4 = scmp.eq.s32.totalorder %s30_s21, 0 }
   0xa   : > { %s2228_s23 = scalar_select %p33_p4, %s2154_s16, %s35_s22  }
   0xe   : > { %180 = sbr.rel (!%p44_p3) target bundleno = 26 (0x1a), region = 32  ;;  %s182_s24 = sand.u32 (%p44_p3), 1, %s2154_s16  }
   0xf   : > { %s1719_s25 = sshll.u32 (%p44_p3), %s2162_s18, 5  ;;  %s1581_s26 = sshll.u32 (%p44_p3), %s182_s24, 7 }
  0x10   : > { %s2236_s29 = scalar_lea.vmem (%p44_p3), %s2506_s0, %s1719_s25  ;;  %s184_s30 = scalar_lea.vmem (%p44_p3), [#allocation3], %s1581_s26 }
  0x11   : > { %v204_v0 = vld [vmem:[%s2236_s29] sm:$0xff] (%p44_p3)   ;;  %v208_v1 = vld [vmem:[%s2236_s29 + $0x8] sm:$0xff] (%p44_p3)   ;;  %v212_v2 = vld [vmem:[%s2236_s29 + $0x10] sm:$0xff] (%p44_p3)  }
  0x12   : > { %205 = vst [vmem:[%s184_s30] sm:$0xff] (%p44_p3), %v204_v0   ;;  %209 = vst [vmem:[%s184_s30 + $0x8] sm:$0xff] (%p44_p3), %v208_v1   ;;  %v216_v3 = vld [vmem:[%s2236_s29 + $0x18] sm:$0xff] (%p44_p3)   ;;  %v220_v4 = vld [vmem:[%s2236_s29 + $0x40] sm:$0xff] (%p44_p3)  }
  0x13   : > { %213 = vst [vmem:[%s184_s30 + $0x10] sm:$0xff] (%p44_p3), %v212_v2   ;;  %v224_v5 = vld [vmem:[%s2236_s29 + $0x48] sm:$0xff] (%p44_p3)   ;;  %217 = vst [vmem:[%s184_s30 + $0x18] sm:$0xff] (%p44_p3), %v216_v3   ;;  %v228_v6 = vld [vmem:[%s2236_s29 + $0x50] sm:$0xff] (%p44_p3)  }
  0x14   : > { %221 = vst [vmem:[%s184_s30 + $0x20] sm:$0xff] (%p44_p3), %v220_v4   ;;  %225 = vst [vmem:[%s184_s30 + $0x28] sm:$0xff] (%p44_p3), %v224_v5   ;;  %v232_v7 = vld [vmem:[%s2236_s29 + $0x58] sm:$0xff] (%p44_p3)   ;;  %v236_v8 = vld [vmem:[%s2236_s29 + $0x80] sm:$0xff] (%p44_p3)  }
  0x15   : > { %229 = vst [vmem:[%s184_s30 + $0x30] sm:$0xff] %v228_v6   ;;  %233 = vst [vmem:[%s184_s30 + $0x38] sm:$0xff] %v232_v7   ;;  %v240_v9 = vld [vmem:[%s2236_s29 + $0x88] sm:$0xff]   ;;  %v244_v10 = vld [vmem:[%s2236_s29 + $0x90] sm:$0xff]  }
  0x16   : > { %237 = vst [vmem:[%s184_s30 + $0x40] sm:$0xff] %v236_v8   ;;  %v248_v11 = vld [vmem:[%s2236_s29 + $0x98] sm:$0xff]   ;;  %241 = vst [vmem:[%s184_s30 + $0x48] sm:$0xff] %v240_v9   ;;  %v252_v12 = vld [vmem:[%s2236_s29 + $0xc0] sm:$0xff]  }
  0x17   : > { %245 = vst [vmem:[%s184_s30 + $0x50] sm:$0xff] %v244_v10   ;;  %249 = vst [vmem:[%s184_s30 + $0x58] sm:$0xff] %v248_v11   ;;  %v256_v13 = vld [vmem:[%s2236_s29 + $0xc8] sm:$0xff]   ;;  %v260_v14 = vld [vmem:[%s2236_s29 + $0xd0] sm:$0xff]  }
  0x18   : > { %253 = vst [vmem:[%s184_s30 + $0x60] sm:$0xff] %v252_v12   ;;  %257 = vst [vmem:[%s184_s30 + $0x68] sm:$0xff] %v256_v13   ;;  %v264_v15 = vld [vmem:[%s2236_s29 + $0xd8] sm:$0xff]  }
  0x19   : > { %261 = vst [vmem:[%s184_s30 + $0x70] sm:$0xff] %v260_v14   ;;  %265 = vst [vmem:[%s184_s30 + $0x78] sm:$0xff] %v264_v15  }
  0x1a PF: > { %p1584_p6 = scmp.ge.s32.totalorder %s2166_s19, 1  ;;  %p353_p7 = scmp.lt.s32.totalorder %s2166_s19, 3 }
  0x1c   : > { %p354_p8 = pnand %p1584_p6, %p353_p7 }
  0x1d   : > { %v2259_v16 = vld [vmem:[%s2507_s1] sm:$0xff] (!%p354_p8)   ;;  %s360_s7 = sand.u32 (!%p354_p8), 1, %s2150_s15   ;;  %v2265_v17 = vld [vmem:[%s2507_s1 + $0x8] sm:$0xff] (!%p354_p8)   ;;  %v2273_v18 = vld [vmem:[%s2507_s1 + $0x10] sm:$0xff] (!%p354_p8)   ;;  %s1586_s8 = sshll.u32 (!%p354_p8), %s2158_s17, 3 }
  0x1e   : > { %357 = sbr.rel (%p354_p8) target bundleno = 636 (0x27c), region = 73  ;;  %1816 = vmatprep.subr.bf16.mxu1 (!%p354_p8), %v2259_v16  ;;  %s1585_s10 = sshll.u32 (!%p354_p8), %s360_s7, 7  ;;  %v2279_v19 = vld [vmem:[%s2507_s1 + $0x18] sm:$0xff] (!%p354_p8)   ;;  %v2290_v21 = vld [vmem:[%s2507_s1 + $0x20] sm:$0xff] (!%p354_p8)   ;;  %v2297_v22 = vld [vmem:[%s2507_s1 + $0x28] sm:$0xff] (!%p354_p8)  }
  0x1f   : > { %1817 = vmatpush3.bf16.msra.mxu1 (!%p354_p8), %v2259_v16  ;;  %s2282_s15 = scalar_lea.vmem (!%p354_p8), [#allocation3], %s1585_s10  ;;  %v2304_v23 = vld [vmem:[%s2507_s1 + $0x30] sm:$0xff] (!%p354_p8)   ;;  %v2310_v24 = vld [vmem:[%s2507_s1 + $0x38] sm:$0xff] (!%p354_p8)   ;;  %v2096_v37 = vld [vmem:[%s2508_s2 + $0x40] sm:$0xff] (!%p354_p8)   ;;  %p398_p9 = scmp.lt.s32.totalorder (!%p354_p8), %s1586_s8, 15 }
  0x20   : > { %1818 = vmatprep.subr.bf16.mxu1 (!%p354_p8), %v2265_v17  ;;  %v2080_v20 = vld [vmem:[%s2282_s15] sm:$0xff] (!%p354_p8)   ;;  %v2081_v25 = vld [vmem:[%s2282_s15 + $0x8] sm:$0xff] (!%p354_p8)   ;;  %v2082_v26 = vld [vmem:[%s2282_s15 + $0x10] sm:$0xff] (!%p354_p8)   ;;  %1864 = vmatprep.subr.bf16.mxu0 (!%p354_p8), %v2096_v37 }
  0x21   : > { %1832 = vmatprep.mubr.bf16.mxu1 (!%p354_p8), %v2080_v20  ;;  %v2083_v27 = vld [vmem:[%s2282_s15 + $0x18] sm:$0xff] (!%p354_p8)   ;;  %v2084_v28 = vld [vmem:[%s2282_s15 + $0x20] sm:$0xff] (!%p354_p8)   ;;  %v2085_v29 = vld [vmem:[%s2282_s15 + $0x28] sm:$0xff] (!%p354_p8)   ;;  %1865 = vmatpush3.bf16.msra.mxu0 (!%p354_p8), %v2096_v37 }
  0x22   : > { %v2086_v30 = vld [vmem:[%s2282_s15 + $0x30] sm:$0xff] (!%p354_p8)   ;;  %v2087_v31 = vld [vmem:[%s2282_s15 + $0x38] sm:$0xff] (!%p354_p8)   ;;  %v2088_v32 = vld [vmem:[%s2282_s15 + $0x40] sm:$0xff] (!%p354_p8)  }
  0x23   : > { %1819 = vmatpush3.bf16.msra.mxu1 (!%p354_p8), %v2265_v17  ;;  %v2089_v33 = vld [vmem:[%s2282_s15 + $0x48] sm:$0xff] (!%p354_p8)   ;;  %v2090_v34 = vld [vmem:[%s2282_s15 + $0x50] sm:$0xff] (!%p354_p8)   ;;  %v2091_v35 = vld [vmem:[%s2282_s15 + $0x58] sm:$0xff] (!%p354_p8)  }
  0x24   : > { %1820 = vmatprep.subr.bf16.mxu1 (!%p354_p8), %v2273_v18  ;;  %v2092_v36 = vld [vmem:[%s2282_s15 + $0x60] sm:$0xff] (!%p354_p8)   ;;  %v2097_v38 = vld [vmem:[%s2508_s2 + $0x48] sm:$0xff] (!%p354_p8)   ;;  %v2098_v39 = vld [vmem:[%s2508_s2 + $0x50] sm:$0xff] (!%p354_p8)  }
  0x25   : > { %1866 = vmatprep.subr.bf16.mxu0 %v2097_v38  ;;  %v2093_v40 = vld [vmem:[%s2282_s15 + $0x68] sm:$0xff]   ;;  %v2094_v41 = vld [vmem:[%s2282_s15 + $0x70] sm:$0xff]   ;;  %v2099_v42 = vld [vmem:[%s2508_s2 + $0x58] sm:$0xff]   ;;  %s2518_s8 = smov (!%p398_p9, %s1586_s8), 15 }
  0x26   : > { %1867 = vmatpush3.bf16.msra.mxu0 %v2097_v38  ;;  %v2100_v43 = vld [vmem:[%s2508_s2 + $0x60] sm:$0xff]   ;;  %v2095_v44 = vld [vmem:[%s2282_s15 + $0x78] sm:$0xff]   ;;  %v2101_v45 = vld [vmem:[%s2508_s2 + $0x68] sm:$0xff]   ;;  %s1587_s11 = sshll.u32 %s2518_s8, 3 }
  0x27   : > { %1821 = vmatpush3.bf16.msra.mxu1 %v2273_v18  ;;  %1868 = vmatprep.subr.bf16.mxu0 %v2098_v39  ;;  %v2102_v46 = vld [vmem:[%s2508_s2 + $0x70] sm:$0xff]   ;;  %v2103_v47 = vld [vmem:[%s2508_s2 + $0x78] sm:$0xff]   ;;  %v2104_v48 = vld [vmem:[%s2508_s2] sm:$0xff]   ;;  %s401_s14 = scalar_lea.vmem %s2510_s4, %s1587_s11 }
  0x28   : > { %1822 = vmatprep.subr.bf16.mxu1 %v2279_v19  ;;  %v2105_v3 = vld [vmem:[%s2508_s2 + $0x8] sm:$0xff]   ;;  %v2106_v6 = vld [vmem:[%s2508_s2 + $0x10] sm:$0xff]   ;;  %v2107_v11 = vld [vmem:[%s2508_s2 + $0x18] sm:$0xff]  }
  0x29   : > { %v2108_v12 = vld [vmem:[%s2508_s2 + $0x20] sm:$0xff]   ;;  %v2109_v13 = vld [vmem:[%s2508_s2 + $0x28] sm:$0xff]   ;;  %v2110_v14 = vld [vmem:[%s2508_s2 + $0x30] sm:$0xff]  }
  0x2a   : > { %1869 = vmatpush3.bf16.msra.mxu0 %v2098_v39  ;;  %v2111_v15 = vld [vmem:[%s2508_s2 + $0x38] sm:$0xff]   ;;  %v2120_v37 = vld [vmem:[%s2508_s2 + $0xc0] sm:$0xff]  }
  0x2b   : > { %1823 = vmatpush3.bf16.msra.mxu1 %v2279_v19  ;;  %1870 = vmatprep.subr.bf16.mxu0 %v2099_v42 }
  0x2c   : > { %1824 = vmatprep.subr.bf16.mxu1 %v2290_v21 }
  0x2e   : > { %1871 = vmatpush3.bf16.msra.mxu0 %v2099_v42 }
  0x2f   : > { %1825 = vmatpush3.bf16.msra.mxu1 %v2290_v21  ;;  %1872 = vmatprep.subr.bf16.mxu0 %v2100_v43 }
  0x30   : > { %1826 = vmatprep.subr.bf16.mxu1 %v2297_v22 }
  0x32   : > { %1873 = vmatpush3.bf16.msra.mxu0 %v2100_v43  ;;  %v2121_v43 = vld [vmem:[%s2508_s2 + $0xc8] sm:$0xff]  }
  0x33   : > { %1827 = vmatpush3.bf16.msra.mxu1 %v2297_v22  ;;  %1874 = vmatprep.subr.bf16.mxu0 %v2101_v45 }
  0x34   : > { %1828 = vmatprep.subr.bf16.mxu1 %v2304_v23 }
  0x36   : > { %1875 = vmatpush3.bf16.msra.mxu0 %v2101_v45  ;;  %v2122_v45 = vld [vmem:[%s2508_s2 + $0xd0] sm:$0xff]  }
  0x37   : > { %1829 = vmatpush3.bf16.msra.mxu1 %v2304_v23  ;;  %1876 = vmatprep.subr.bf16.mxu0 %v2102_v46 }
  0x38   : > { %1830 = vmatprep.subr.bf16.mxu1 %v2310_v24 }
  0x3a   : > { %1877 = vmatpush3.bf16.msra.mxu0 %v2102_v46 }
  0x3b   : > { %1831 = vmatpush3.bf16.msra.mxu1 %v2310_v24  ;;  %1878 = vmatprep.subr.bf16.mxu0 %v2103_v47 }
  0x3c   : > { %1840 = vmatprep.subr.bf16.mxu1 %v2259_v16 }
  0x3e   : > { %1833 = vmatmul.mubr.bf16.vlgmr.msra.gmra.mrb[0].mxu1 %v2081_v25  ;;  %1879 = vmatpush3.bf16.msra.mxu0 %v2103_v47  ;;  %v2114_v25 = vld [vmem:[%s2508_s2 + $0x90] sm:$0xff]  }
  0x3f   : > { %1841 = vmatpush3.bf16.msra.mxu1 %v2259_v16  ;;  %1836 = vmatprep.mubr.bf16.mxu1 %v2082_v26 }
  0x40   : > { %1842 = vmatprep.subr.bf16.mxu1 %v2265_v17  ;;  %1888 = vmatprep.subr.bf16.mxu0 %v2104_v48 }
  0x43   : > { %1843 = vmatpush3.bf16.msra.mxu1 %v2265_v17 }
  0x44   : > { %1844 = vmatprep.subr.bf16.mxu1 %v2273_v18 }
  0x46   : > { %1837 = vmatmul.mubr.bf16.gmra.mrb[4].mxu1 %v2083_v27 }
  0x47   : > { %1845 = vmatpush3.bf16.msra.mxu1 %v2273_v18  ;;  %1856 = vmatprep.mubr.bf16.mxu1 %v2084_v28 }
  0x48   : > { %1846 = vmatprep.subr.bf16.mxu1 %v2279_v19 }
  0x4b   : > { %1847 = vmatpush3.bf16.msra.mxu1 %v2279_v19 }
  0x4c   : > { %1848 = vmatprep.subr.bf16.mxu1 %v2290_v21 }
  0x4f   : > { %1849 = vmatpush3.bf16.msra.mxu1 %v2290_v21 }
  0x50   : > { %1850 = vmatprep.subr.bf16.mxu1 %v2297_v22 }
  0x53   : > { %1851 = vmatpush3.bf16.msra.mxu1 %v2297_v22 }
  0x54   : > { %1852 = vmatprep.subr.bf16.mxu1 %v2304_v23 }
  0x57   : > { %1853 = vmatpush3.bf16.msra.mxu1 %v2304_v23 }
  0x58   : > { %1854 = vmatprep.subr.bf16.mxu1 %v2310_v24 }
  0x5b   : > { %1855 = vmatpush3.bf16.msra.mxu1 %v2310_v24 }
  0x5c   : > { %1912 = vmatprep.subr.bf16.mxu1 %v2259_v16 }
  0x5e   : > { %1857 = vmatmul.mubr.bf16.vlgmr.msra.gmra.mrb[8].mxu1 %v2085_v29 }
  0x5f   : > { %1860 = vmatprep.mubr.bf16.mxu1 %v2086_v30  ;;  %1913 = vmatpush3.bf16.msra.mxu1 %v2259_v16 }
  0x60   : > { %1914 = vmatprep.subr.bf16.mxu1 %v2265_v17 }
  0x63   : > { %1915 = vmatpush3.bf16.msra.mxu1 %v2265_v17 }
  0x64   : > { %1916 = vmatprep.subr.bf16.mxu1 %v2273_v18 }
  0x66   : > { %1861 = vmatmul.mubr.bf16.gmra.mrb[12].mxu1 %v2087_v31  ;;  %v2115_v31 = vld [vmem:[%s2508_s2 + $0x98] sm:$0xff]  }
  0x67   : > { %1917 = vmatpush3.bf16.msra.mxu1 %v2273_v18  ;;  %1928 = vmatprep.mubr.bf16.mxu1 %v2088_v32  ;;  %v2116_v32 = vld [vmem:[%s2508_s2 + $0xa0] sm:$0xff]  }
  0x68   : > { %1918 = vmatprep.subr.bf16.mxu1 %v2279_v19 }
  0x6b   : > { %1919 = vmatpush3.bf16.msra.mxu1 %v2279_v19 }
  0x6c   : > { %1920 = vmatprep.subr.bf16.mxu1 %v2290_v21 }
  0x6f   : > { %1921 = vmatpush3.bf16.msra.mxu1 %v2290_v21 }
  0x70   : > { %1922 = vmatprep.subr.bf16.mxu1 %v2297_v22 }
  0x73   : > { %1923 = vmatpush3.bf16.msra.mxu1 %v2297_v22 }
  0x74   : > { %1924 = vmatprep.subr.bf16.mxu1 %v2304_v23 }
  0x77   : > { %1925 = vmatpush3.bf16.msra.mxu1 %v2304_v23 }
  0x78   : > { %1926 = vmatprep.subr.bf16.mxu1 %v2310_v24 }
  0x7b   : > { %1927 = vmatpush3.bf16.msra.mxu1 %v2310_v24 }
  0x7c   : > { %1960 = vmatprep.subr.bf16.mxu1 %v2259_v16 }
  0x7e   : > { %1929 = vmatmul.mubr.bf16.vlgmr.msra.gmra.mrb[16].mxu1 %v2089_v33  ;;  %v2117_v33 = vld [vmem:[%s2508_s2 + $0xa8] sm:$0xff]  }
  0x7f   : > { %1961 = vmatpush3.bf16.msra.mxu1 %v2259_v16  ;;  %1932 = vmatprep.mubr.bf16.mxu1 %v2090_v34  ;;  %v2118_v34 = vld [vmem:[%s2508_s2 + $0xb0] sm:$0xff]  }
  0x80   : > { %1962 = vmatprep.subr.bf16.mxu1 %v2265_v17 }
  0x83   : > { %1963 = vmatpush3.bf16.msra.mxu1 %v2265_v17  ;;  %v2112_v17 = vld [vmem:[%s2508_s2 + $0x80] sm:$0xff]  }
  0x84   : > { %1964 = vmatprep.subr.bf16.mxu1 %v2273_v18 }
  0x86   : > { %1933 = vmatmul.mubr.bf16.gmra.mrb[20].mxu1 %v2091_v35  ;;  %v2119_v35 = vld [vmem:[%s2508_s2 + $0xb8] sm:$0xff]  }
  0x87   : > { %1965 = vmatpush3.bf16.msra.mxu1 %v2273_v18  ;;  %1976 = vmatprep.mubr.bf16.mxu1 %v2092_v36 }
  0x88   : > { %1966 = vmatprep.subr.bf16.mxu1 %v2279_v19 }
  0x8b   : > { %1967 = vmatpush3.bf16.msra.mxu1 %v2279_v19 }
  0x8c   : > { %1968 = vmatprep.subr.bf16.mxu1 %v2290_v21 }
  0x8f   : > { %1969 = vmatpush3.bf16.msra.mxu1 %v2290_v21 }
  0x90   : > { %1970 = vmatprep.subr.bf16.mxu1 %v2297_v22 }
  0x93   : > { %1971 = vmatpush3.bf16.msra.mxu1 %v2297_v22 }
  0x94   : > { %1972 = vmatprep.subr.bf16.mxu1 %v2304_v23 }
  0x97   : > { %1973 = vmatpush3.bf16.msra.mxu1 %v2304_v23  ;;  %v2113_v23 = vld [vmem:[%s2508_s2 + $0x88] sm:$0xff]  }
  0x98   : > { %1974 = vmatprep.subr.bf16.mxu1 %v2310_v24 }
  0x9b   : > { %1975 = vmatpush3.bf16.msra.mxu1 %v2310_v24 }
  0x9e   : > { %1977 = vmatmul.mubr.bf16.vlgmr.msra.gmra.mrb[24].mxu1 %v2093_v40 }
  0x9f   : > { %1980 = vmatprep.mubr.bf16.mxu1 %v2094_v41 }
  0xa6   : > { %1981 = vmatmul.mubr.bf16.gmra.mrb[28].mxu1 %v2095_v44 }
 0x111   : > { %v1834_v49 = vpop.f32.mrb[0].mxu1 }
 0x112   : > { %v546_v50 = vpop.f32.mrb[1].mxu1 }
 0x113   : > { %v1835_v51 = vpop.f32.mrb[2].mxu1 }
 0x114   : > { %v578_v52 = vpack.c.bf16 %v1835_v51, %v1834_v49  ;;  %v549_v53 = vpop.f32.mrb[3].mxu1  ;;  %v2123_v51 = vld [vmem:[%s2508_s2 + $0xd8] sm:$0xff]  }
 0x115   : > { %v577_v54 = vpack.c.bf16 %v549_v53, %v546_v50  ;;  %v2125_v53 = vld [vmem:[%s2508_s2 + $0xe8] sm:$0xff]  }
 0x119   : > { %v2406_v55 = vpop.f32.mrb[4].mxu1 }
 0x11a   : > { %v562_v56 = vpop.f32.mrb[5].mxu1 }
 0x11b   : > { %v2408_v57 = vpop.f32.mrb[6].mxu1 }
 0x11c   : > { %v580_v58 = vpack.c.bf16 %v2408_v57, %v2406_v55  ;;  %v565_v59 = vpop.f32.mrb[7].mxu1  ;;  %v2127_v55 = vld [vmem:[%s2508_s2 + $0xf8] sm:$0xff]  }
 0x11d   : > { %v579_v60 = vpack.c.bf16 %v565_v59, %v562_v56  ;;  %v1716_v56 = vld [vmem:[%s2509_s3] ss:$0 sm:$0xff] }
 0x131   : > { %v1858_v61 = vpop.f32.mrb[8].mxu1 }
 0x132   : > { %v664_v62 = vpop.f32.mrb[9].mxu1 }
 0x133   : > { %v1859_v63 = vpop.f32.mrb[10].mxu1 }
 0x134   : > { %v696_v0 = vpack.c.bf16 %v1859_v63, %v1858_v61  ;;  %v667_v1 = vpop.f32.mrb[11].mxu1 }
 0x135   : > { %v695_v2 = vpack.c.bf16 %v667_v1, %v664_v62 }
 0x137   : > { %1880 = vmatprep.mubr.bf16.mxu0 %v695_v2 }
 0x138   : > { %1881 = vmatmul.mubr.bf16.vlgmr.msra.gmra.mrb[0].mxu0 %v696_v0 }
 0x139   : > { %1889 = vmatpush3.bf16.msra.mxu0 %v2104_v48  ;;  %v1862_v4 = vpop.f32.mrb[12].mxu1 }
 0x13a   : > { %v680_v5 = vpop.f32.mrb[13].mxu1  ;;  %1890 = vmatprep.subr.bf16.mxu0 %v2105_v3 }
 0x13b   : > { %v1863_v7 = vpop.f32.mrb[14].mxu1 }
 0x13c   : > { %v698_v8 = vpack.c.bf16 %v1863_v7, %v1862_v4  ;;  %v683_v9 = vpop.f32.mrb[15].mxu1 }
 0x13d   : > { %v697_v10 = vpack.c.bf16 %v683_v9, %v680_v5  ;;  %1891 = vmatpush3.bf16.msra.mxu0 %v2105_v3 }
 0x13e   : > { %1892 = vmatprep.subr.bf16.mxu0 %v2106_v6 }
 0x13f   : > { %1884 = vmatprep.mubr.bf16.mxu0 %v697_v10 }
 0x140   : > { %1885 = vmatmul.mubr.bf16.gmra.mrb[4].mxu0 %v698_v8 }
 0x141   : > { %1893 = vmatpush3.bf16.msra.mxu0 %v2106_v6  ;;  %1904 = vmatprep.mubr.bf16.mxu0 %v577_v54  ;;  %v2126_v54 = vld [vmem:[%s2508_s2 + $0xf0] sm:$0xff]  }
 0x142   : > { %1894 = vmatprep.subr.bf16.mxu0 %v2107_v11 }
 0x145   : > { %1895 = vmatpush3.bf16.msra.mxu0 %v2107_v11 }
 0x146   : > { %1896 = vmatprep.subr.bf16.mxu0 %v2108_v12 }
 0x149   : > { %1897 = vmatpush3.bf16.msra.mxu0 %v2108_v12 }
 0x14a   : > { %1898 = vmatprep.subr.bf16.mxu0 %v2109_v13 }
 0x14d   : > { %1899 = vmatpush3.bf16.msra.mxu0 %v2109_v13 }
 0x14e   : > { %1900 = vmatprep.subr.bf16.mxu0 %v2110_v14 }
 0x151   : > { %1901 = vmatpush3.bf16.msra.mxu0 %v2110_v14  ;;  %v1930_v16 = vpop.f32.mrb[16].mxu1 }
 0x152   : > { %1902 = vmatprep.subr.bf16.mxu0 %v2111_v15  ;;  %v1009_v18 = vpop.f32.mrb[17].mxu1 }
 0x153   : > { %v1931_v19 = vpop.f32.mrb[18].mxu1 }
 0x154   : > { %v1041_v20 = vpack.c.bf16 %v1931_v19, %v1930_v16  ;;  %v1012_v21 = vpop.f32.mrb[19].mxu1 }
 0x155   : > { %1903 = vmatpush3.bf16.msra.mxu0 %v2111_v15  ;;  %v1040_v22 = vpack.c.bf16 %v1012_v21, %v1009_v18 }
 0x156   : > { %1936 = vmatprep.subr.bf16.mxu0 %v2112_v17 }
 0x158   : > { %1905 = vmatmul.mubr.bf16.vlgmr.msra.gmra.mrb[0].mxu0 %v578_v52  ;;  %v2124_v52 = vld [vmem:[%s2508_s2 + $0xe0] sm:$0xff]  }
 0x159   : > { %1908 = vmatprep.mubr.bf16.mxu0 %v579_v60  ;;  %1937 = vmatpush3.bf16.msra.mxu0 %v2112_v17  ;;  %v1934_v24 = vpop.f32.mrb[20].mxu1 }
 0x15a   : > { %1938 = vmatprep.subr.bf16.mxu0 %v2113_v23  ;;  %v1025_v26 = vpop.f32.mrb[21].mxu1 }
 0x15b   : > { %v1935_v27 = vpop.f32.mrb[22].mxu1 }
 0x15c   : > { %v1043_v28 = vpack.c.bf16 %v1935_v27, %v1934_v24  ;;  %v1028_v29 = vpop.f32.mrb[23].mxu1 }
 0x15d   : > { %1939 = vmatpush3.bf16.msra.mxu0 %v2113_v23  ;;  %v1042_v30 = vpack.c.bf16 %v1028_v29, %v1025_v26 }
 0x15e   : > { %1940 = vmatprep.subr.bf16.mxu0 %v2114_v25 }
 0x160   : > { %1909 = vmatmul.mubr.bf16.gmra.mrb[4].mxu0 %v580_v58 }
 0x161   : > { %1941 = vmatpush3.bf16.msra.mxu0 %v2114_v25  ;;  %1952 = vmatprep.mubr.bf16.mxu0 %v1040_v22 }
 0x162   : > { %1942 = vmatprep.subr.bf16.mxu0 %v2115_v31 }
 0x165   : > { %1943 = vmatpush3.bf16.msra.mxu0 %v2115_v31 }
 0x166   : > { %1944 = vmatprep.subr.bf16.mxu0 %v2116_v32 }
 0x169   : > { %1945 = vmatpush3.bf16.msra.mxu0 %v2116_v32 }
 0x16a   : > { %1946 = vmatprep.subr.bf16.mxu0 %v2117_v33 }
 0x16d   : > { %1947 = vmatpush3.bf16.msra.mxu0 %v2117_v33 }
 0x16e   : > { %1948 = vmatprep.subr.bf16.mxu0 %v2118_v34 }
 0x171   : > { %1949 = vmatpush3.bf16.msra.mxu0 %v2118_v34  ;;  %v1978_v36 = vpop.f32.mrb[24].mxu1 }
 0x172   : > { %1950 = vmatprep.subr.bf16.mxu0 %v2119_v35  ;;  %v1249_v38 = vpop.f32.mrb[25].mxu1 }
 0x173   : > { %v1979_v39 = vpop.f32.mrb[26].mxu1 }
 0x174   : > { %v1281_v40 = vpack.c.bf16 %v1979_v39, %v1978_v36  ;;  %v1252_v41 = vpop.f32.mrb[27].mxu1 }
 0x175   : > { %1951 = vmatpush3.bf16.msra.mxu0 %v2119_v35  ;;  %v1280_v42 = vpack.c.bf16 %v1252_v41, %v1249_v38 }
 0x176   : > { %1984 = vmatprep.subr.bf16.mxu0 %v2120_v37 }
 0x178   : > { %1953 = vmatmul.mubr.bf16.vlgmr.msra.gmra.mrb[0].mxu0 %v1041_v20 }
 0x179   : > { %1985 = vmatpush3.bf16.msra.mxu0 %v2120_v37  ;;  %1956 = vmatprep.mubr.bf16.mxu0 %v1042_v30  ;;  %v1982_v44 = vpop.f32.mrb[28].mxu1 }
 0x17a   : > { %1986 = vmatprep.subr.bf16.mxu0 %v2121_v43  ;;  %v1265_v46 = vpop.f32.mrb[29].mxu1 }
 0x17b   : > { %v1983_v47 = vpop.f32.mrb[30].mxu1 }
 0x17c   : > { %v1283_v48 = vpack.c.bf16 %v1983_v47, %v1982_v44  ;;  %v1268_v49 = vpop.f32.mrb[31].mxu1 }
 0x17d   : > { %1987 = vmatpush3.bf16.msra.mxu0 %v2121_v43  ;;  %v1282_v50 = vpack.c.bf16 %v1268_v49, %v1265_v46 }
 0x17e   : > { %1988 = vmatprep.subr.bf16.mxu0 %v2122_v45 }
 0x180   : > { %1957 = vmatmul.mubr.bf16.gmra.mrb[4].mxu0 %v1043_v28 }
 0x181   : > { %1989 = vmatpush3.bf16.msra.mxu0 %v2122_v45  ;;  %2000 = vmatprep.mubr.bf16.mxu0 %v1280_v42 }
 0x182   : > { %1990 = vmatprep.subr.bf16.mxu0 %v2123_v51 }
 0x185   : > { %1991 = vmatpush3.bf16.msra.mxu0 %v2123_v51 }
 0x186   : > { %1992 = vmatprep.subr.bf16.mxu0 %v2124_v52 }
 0x189   : > { %1993 = vmatpush3.bf16.msra.mxu0 %v2124_v52 }
 0x18a   : > { %1994 = vmatprep.subr.bf16.mxu0 %v2125_v53 }
 0x18d   : > { %1995 = vmatpush3.bf16.msra.mxu0 %v2125_v53 }
 0x18e   : > { %1996 = vmatprep.subr.bf16.mxu0 %v2126_v54 }
 0x191   : > { %1997 = vmatpush3.bf16.msra.mxu0 %v2126_v54 }
 0x192   : > { %1998 = vmatprep.subr.bf16.mxu0 %v2127_v55 }
 0x195   : > { %1999 = vmatpush3.bf16.msra.mxu0 %v2127_v55 }
 0x198   : > { %2001 = vmatmul.mubr.bf16.vlgmr.msra.gmra.mrb[0].mxu0 %v1281_v40 }
 0x199   : > { %2004 = vmatprep.mubr.bf16.mxu0 %v1282_v50 }
 0x1a0   : > { %2005 = vmatmul.mubr.bf16.gmra.mrb[4].mxu0 %v1283_v48 }
 0x26b   : > { %v2002_v57 = vpop.f32.mrb[0].mxu0 }
 0x26c   : > { %v1466_v58 = vadd.f32 %v2002_v57, %v1716_v56  ;;  %v1383_v59 = vpop.f32.mrb[1].mxu0 }
 0x26d   : > { %v1464_v60 = vadd.f32 %v1716_v56, %v1383_v59  ;;  %v2003_v61 = vpop.f32.mrb[2].mxu0 }
 0x26e   : > { %v1474_v62 = vmax.f32 %v1466_v58, 0.0  ;;  %v1467_v63 = vadd.f32 %v2003_v61, %v1716_v56  ;;  %v1386_v0 = vpop.f32.mrb[3].mxu0 }
 0x26f   : > { %v1472_v1 = vmax.f32 %v1464_v60, 0.0  ;;  %v1465_v2 = vadd.f32 %v1716_v56, %v1386_v0 }
 0x270   : > { %1482 = vst [vmem:[%s401_s14 + $0x10] sm:$0xff] %v1474_v62  ;;  %v1475_v3 = vmax.f32 %v1467_v63, 0.0 }
 0x271   : > { %1480 = vst [vmem:[%s401_s14] sm:$0xff] %v1472_v1  ;;  %v1473_v4 = vmax.f32 %v1465_v2, 0.0 }
 0x272   : > { %1483 = vst [vmem:[%s401_s14 + $0x18] sm:$0xff] %v1475_v3 }
 0x273   : > { %1481 = vst [vmem:[%s401_s14 + $0x8] sm:$0xff] %v1473_v4  ;;  %v2006_v5 = vpop.f32.mrb[4].mxu0 }
 0x274   : > { %v1470_v6 = vadd.f32 %v2006_v5, %v1716_v56  ;;  %v1399_v7 = vpop.f32.mrb[5].mxu0 }
 0x275   : > { %v1468_v8 = vadd.f32 %v1716_v56, %v1399_v7  ;;  %v2007_v9 = vpop.f32.mrb[6].mxu0 }
 0x276   : > { %v1478_v10 = vmax.f32 %v1470_v6, 0.0  ;;  %v1471_v11 = vadd.f32 %v2007_v9, %v1716_v56  ;;  %v1402_v12 = vpop.f32.mrb[7].mxu0 }
 0x277   : > { %v1476_v13 = vmax.f32 %v1468_v8, 0.0  ;;  %v1469_v14 = vadd.f32 %v1716_v56, %v1402_v12 }
 0x278   : > { %1486 = vst [vmem:[%s401_s14 + $0x30] sm:$0xff] %v1478_v10  ;;  %v1479_v15 = vmax.f32 %v1471_v11, 0.0 }
 0x279   : > { %1484 = vst [vmem:[%s401_s14 + $0x20] sm:$0xff] %v1476_v13  ;;  %v1477_v16 = vmax.f32 %v1469_v14, 0.0 }
 0x27a   : > { %1487 = vst [vmem:[%s401_s14 + $0x38] sm:$0xff] %v1479_v15 }
 0x27b   : > { %1485 = vst [vmem:[%s401_s14 + $0x28] sm:$0xff] %v1477_v16 }
 0x27c PF: > { %s14_s19 = sadd.s32 1, %s2166_s19   ;;  %s2511_s15 = smov %s2154_s16 }
 0x27d   : > { %p11_p10 = scmp.ge.s32.totalorder %s14_s19, 4   ;;  %s2512_s16 = smov %s2228_s23 }
 0x27e   : > { %s2513_s17 = smov %s2162_s18  ;;  %s2514_s18 = smov %s2516_s20 }
 0x27f   :  { %13 = sbr.rel (!%p11_p10) target bundleno = 3 (0x3), region = 129 }

// kernel: rgcn_forward.2
= control target key start
LH: loop header
LB: loop body
LE: loop exit
PB: predicated region body
PF: predicated region fallthrough
CT: control target
= control target key end

     0   :  { %s2264_s15 = smov 0   ;;  %s2266_s16 = smov 0   ;;  %s2577_s0 = inlined_call_operand.vmem [shape: bf16[4,128,128], index: 0, kind: input, shape index: {}]   ;;  %s2578_s1 = inlined_call_operand.vmem [shape: bf16[128,128], index: 1, kind: input, shape index: {}]   ;;  %s2579_s2 = inlined_call_operand.vmem [shape: bf16[4,128,128], index: 2, kind: input, shape index: {}]   ;;  %s2580_s3 = inlined_call_operand.vmem [shape: f32[1,128], index: 3, kind: input, shape index: {}]   ;;  %s2581_s4 = inlined_call_operand.vmem [shape: bf16[128,128], index: 4, kind: output, shape index: {}]  }
   0x1   :  { %s2268_s17 = smov 0   ;;  %s2270_s18 = smov 0  }
   0x2   :  { %s2272_s19 = smov 0  }
   0x3 LB: > { %s26_s20 = sadd.s32 1, %s2233_s18  ;;  %p42_p1 = scmp.ne.s32.totalorder %s2225_s16, %s2221_s15  ;;  %s2237_s19 = sphi %s2272_s19, %s14_s19   ;;  %s2233_s18 = sphi %s2270_s18, %s2585_s18   ;;  %s2229_s17 = sphi %s2268_s17, %s2584_s17   ;;  %s2225_s16 = sphi %s2266_s16, %s2583_s16   ;;  %s2221_s15 = sphi %s2264_s15, %s2582_s15  }
   0x4   : > { %p28_p0 = scmp.ge.s32.totalorder %s26_s20, 2  ;;  %p43_p2 = scmp.eq.s32.totalorder %s2237_s19, 0 }
   0x5   : > { %s35_s22 = sadd.s32 1, %s2225_s16  ;;  %p1612_p5 = scmp.ge.s32.totalorder %s2237_s19, 2 }
   0x6   : > { %s2587_s20 = smov (%p28_p0, %s26_s20), 0  ;;  %p44_p3 = por %p43_p2, %p42_p1 }
   0x7   : > { %s30_s21 = ssub.s32 %s2233_s18, %s2587_s20  ;;  %177 = sbr.rel (%p1612_p5) target bundleno = 26 (0x1a), region = 28 }
   0x8   : > { %p33_p4 = scmp.eq.s32.totalorder %s30_s21, 0 }
   0xa   : > { %s2299_s23 = scalar_select %p33_p4, %s2225_s16, %s35_s22  }
   0xe   : > { %180 = sbr.rel (!%p44_p3) target bundleno = 26 (0x1a), region = 32  ;;  %s182_s24 = sand.u32 (%p44_p3), 1, %s2225_s16  }
   0xf   : > { %s1759_s25 = sshll.u32 (%p44_p3), %s2233_s18, 5  ;;  %s1613_s26 = sshll.u32 (%p44_p3), %s182_s24, 7 }
  0x10   : > { %s2307_s29 = scalar_lea.vmem (%p44_p3), %s2577_s0, %s1759_s25  ;;  %s184_s30 = scalar_lea.vmem (%p44_p3), [#allocation3], %s1613_s26 }
  0x11   : > { %v204_v0 = vld [vmem:[%s2307_s29] sm:$0xff] (%p44_p3)   ;;  %v208_v1 = vld [vmem:[%s2307_s29 + $0x8] sm:$0xff] (%p44_p3)   ;;  %v212_v2 = vld [vmem:[%s2307_s29 + $0x10] sm:$0xff] (%p44_p3)  }
  0x12   : > { %205 = vst [vmem:[%s184_s30] sm:$0xff] (%p44_p3), %v204_v0   ;;  %209 = vst [vmem:[%s184_s30 + $0x8] sm:$0xff] (%p44_p3), %v208_v1   ;;  %v216_v3 = vld [vmem:[%s2307_s29 + $0x18] sm:$0xff] (%p44_p3)   ;;  %v220_v4 = vld [vmem:[%s2307_s29 + $0x40] sm:$0xff] (%p44_p3)  }
  0x13   : > { %213 = vst [vmem:[%s184_s30 + $0x10] sm:$0xff] (%p44_p3), %v212_v2   ;;  %v224_v5 = vld [vmem:[%s2307_s29 + $0x48] sm:$0xff] (%p44_p3)   ;;  %217 = vst [vmem:[%s184_s30 + $0x18] sm:$0xff] (%p44_p3), %v216_v3   ;;  %v228_v6 = vld [vmem:[%s2307_s29 + $0x50] sm:$0xff] (%p44_p3)  }
  0x14   : > { %221 = vst [vmem:[%s184_s30 + $0x20] sm:$0xff] (%p44_p3), %v220_v4   ;;  %225 = vst [vmem:[%s184_s30 + $0x28] sm:$0xff] (%p44_p3), %v224_v5   ;;  %v232_v7 = vld [vmem:[%s2307_s29 + $0x58] sm:$0xff] (%p44_p3)   ;;  %v236_v8 = vld [vmem:[%s2307_s29 + $0x80] sm:$0xff] (%p44_p3)  }
  0x15   : > { %229 = vst [vmem:[%s184_s30 + $0x30] sm:$0xff] %v228_v6   ;;  %233 = vst [vmem:[%s184_s30 + $0x38] sm:$0xff] %v232_v7   ;;  %v240_v9 = vld [vmem:[%s2307_s29 + $0x88] sm:$0xff]   ;;  %v244_v10 = vld [vmem:[%s2307_s29 + $0x90] sm:$0xff]  }
  0x16   : > { %237 = vst [vmem:[%s184_s30 + $0x40] sm:$0xff] %v236_v8   ;;  %v248_v11 = vld [vmem:[%s2307_s29 + $0x98] sm:$0xff]   ;;  %241 = vst [vmem:[%s184_s30 + $0x48] sm:$0xff] %v240_v9   ;;  %v252_v12 = vld [vmem:[%s2307_s29 + $0xc0] sm:$0xff]  }
  0x17   : > { %245 = vst [vmem:[%s184_s30 + $0x50] sm:$0xff] %v244_v10   ;;  %249 = vst [vmem:[%s184_s30 + $0x58] sm:$0xff] %v248_v11   ;;  %v256_v13 = vld [vmem:[%s2307_s29 + $0xc8] sm:$0xff]   ;;  %v260_v14 = vld [vmem:[%s2307_s29 + $0xd0] sm:$0xff]  }
  0x18   : > { %253 = vst [vmem:[%s184_s30 + $0x60] sm:$0xff] %v252_v12   ;;  %257 = vst [vmem:[%s184_s30 + $0x68] sm:$0xff] %v256_v13   ;;  %v264_v15 = vld [vmem:[%s2307_s29 + $0xd8] sm:$0xff]  }
  0x19   : > { %261 = vst [vmem:[%s184_s30 + $0x70] sm:$0xff] %v260_v14   ;;  %265 = vst [vmem:[%s184_s30 + $0x78] sm:$0xff] %v264_v15  }
  0x1a PF: > { %p1616_p6 = scmp.ge.s32.totalorder %s2237_s19, 1  ;;  %p353_p7 = scmp.lt.s32.totalorder %s2237_s19, 3 }
  0x1c   : > { %p354_p8 = pnand %p1616_p6, %p353_p7 }
  0x1d   : > { %v2330_v16 = vld [vmem:[%s2578_s1] sm:$0xff] (!%p354_p8)   ;;  %s360_s7 = sand.u32 (!%p354_p8), 1, %s2221_s15   ;;  %v2336_v17 = vld [vmem:[%s2578_s1 + $0x8] sm:$0xff] (!%p354_p8)   ;;  %v2344_v18 = vld [vmem:[%s2578_s1 + $0x10] sm:$0xff] (!%p354_p8)   ;;  %s1618_s8 = sshll.u32 (!%p354_p8), %s2229_s17, 3 }
  0x1e   : > { %357 = sbr.rel (%p354_p8) target bundleno = 638 (0x27e), region = 73  ;;  %1887 = vmatprep.subr.bf16.mxu1 (!%p354_p8), %v2330_v16  ;;  %s1617_s10 = sshll.u32 (!%p354_p8), %s360_s7, 7  ;;  %v2350_v19 = vld [vmem:[%s2578_s1 + $0x18] sm:$0xff] (!%p354_p8)   ;;  %v2361_v21 = vld [vmem:[%s2578_s1 + $0x20] sm:$0xff] (!%p354_p8)   ;;  %v2368_v22 = vld [vmem:[%s2578_s1 + $0x28] sm:$0xff] (!%p354_p8)  }
  0x1f   : > { %1888 = vmatpush3.bf16.msra.mxu1 (!%p354_p8), %v2330_v16  ;;  %s2353_s15 = scalar_lea.vmem (!%p354_p8), [#allocation3], %s1617_s10  ;;  %v2375_v23 = vld [vmem:[%s2578_s1 + $0x30] sm:$0xff] (!%p354_p8)   ;;  %v2381_v24 = vld [vmem:[%s2578_s1 + $0x38] sm:$0xff] (!%p354_p8)   ;;  %v2167_v37 = vld [vmem:[%s2579_s2 + $0x40] sm:$0xff] (!%p354_p8)   ;;  %p398_p9 = scmp.lt.s32.totalorder (!%p354_p8), %s1618_s8, 15 }
  0x20   : > { %1889 = vmatprep.subr.bf16.mxu1 (!%p354_p8), %v2336_v17  ;;  %v2151_v20 = vld [vmem:[%s2353_s15] sm:$0xff] (!%p354_p8)   ;;  %v2152_v25 = vld [vmem:[%s2353_s15 + $0x8] sm:$0xff] (!%p354_p8)   ;;  %v2153_v26 = vld [vmem:[%s2353_s15 + $0x10] sm:$0xff] (!%p354_p8)   ;;  %1935 = vmatprep.subr.bf16.mxu0 (!%p354_p8), %v2167_v37 }
  0x21   : > { %1903 = vmatprep.mubr.bf16.mxu1 (!%p354_p8), %v2151_v20  ;;  %v2154_v27 = vld [vmem:[%s2353_s15 + $0x18] sm:$0xff] (!%p354_p8)   ;;  %v2155_v28 = vld [vmem:[%s2353_s15 + $0x20] sm:$0xff] (!%p354_p8)   ;;  %v2156_v29 = vld [vmem:[%s2353_s15 + $0x28] sm:$0xff] (!%p354_p8)   ;;  %1936 = vmatpush3.bf16.msra.mxu0 (!%p354_p8), %v2167_v37 }
  0x22   : > { %v2157_v30 = vld [vmem:[%s2353_s15 + $0x30] sm:$0xff] (!%p354_p8)   ;;  %v2158_v31 = vld [vmem:[%s2353_s15 + $0x38] sm:$0xff] (!%p354_p8)   ;;  %v2159_v32 = vld [vmem:[%s2353_s15 + $0x40] sm:$0xff] (!%p354_p8)  }
  0x23   : > { %1890 = vmatpush3.bf16.msra.mxu1 (!%p354_p8), %v2336_v17  ;;  %v2160_v33 = vld [vmem:[%s2353_s15 + $0x48] sm:$0xff] (!%p354_p8)   ;;  %v2161_v34 = vld [vmem:[%s2353_s15 + $0x50] sm:$0xff] (!%p354_p8)   ;;  %v2162_v35 = vld [vmem:[%s2353_s15 + $0x58] sm:$0xff] (!%p354_p8)  }
  0x24   : > { %1891 = vmatprep.subr.bf16.mxu1 (!%p354_p8), %v2344_v18  ;;  %v2163_v36 = vld [vmem:[%s2353_s15 + $0x60] sm:$0xff] (!%p354_p8)   ;;  %v2168_v38 = vld [vmem:[%s2579_s2 + $0x48] sm:$0xff] (!%p354_p8)   ;;  %v2169_v39 = vld [vmem:[%s2579_s2 + $0x50] sm:$0xff] (!%p354_p8)  }
  0x25   : > { %1937 = vmatprep.subr.bf16.mxu0 %v2168_v38  ;;  %v2164_v40 = vld [vmem:[%s2353_s15 + $0x68] sm:$0xff]   ;;  %v2165_v41 = vld [vmem:[%s2353_s15 + $0x70] sm:$0xff]   ;;  %v2170_v42 = vld [vmem:[%s2579_s2 + $0x58] sm:$0xff]   ;;  %s2589_s8 = smov (!%p398_p9, %s1618_s8), 15 }
  0x26   : > { %1938 = vmatpush3.bf16.msra.mxu0 %v2168_v38  ;;  %v2171_v43 = vld [vmem:[%s2579_s2 + $0x60] sm:$0xff]   ;;  %v2166_v44 = vld [vmem:[%s2353_s15 + $0x78] sm:$0xff]   ;;  %v2172_v45 = vld [vmem:[%s2579_s2 + $0x68] sm:$0xff]   ;;  %s1619_s11 = sshll.u32 %s2589_s8, 2 }
  0x27   : > { %1892 = vmatpush3.bf16.msra.mxu1 %v2344_v18  ;;  %1939 = vmatprep.subr.bf16.mxu0 %v2169_v39  ;;  %v2173_v46 = vld [vmem:[%s2579_s2 + $0x70] sm:$0xff]   ;;  %v2174_v47 = vld [vmem:[%s2579_s2 + $0x78] sm:$0xff]   ;;  %v2175_v48 = vld [vmem:[%s2579_s2] sm:$0xff]   ;;  %s401_s13 = scalar_lea.vmem %s2581_s4, %s1619_s11 }
  0x28   : > { %1893 = vmatprep.subr.bf16.mxu1 %v2350_v19  ;;  %v2176_v3 = vld [vmem:[%s2579_s2 + $0x8] sm:$0xff]   ;;  %v2177_v6 = vld [vmem:[%s2579_s2 + $0x10] sm:$0xff]   ;;  %v2178_v11 = vld [vmem:[%s2579_s2 + $0x18] sm:$0xff]  }
  0x29   : > { %v2179_v12 = vld [vmem:[%s2579_s2 + $0x20] sm:$0xff]   ;;  %v2180_v13 = vld [vmem:[%s2579_s2 + $0x28] sm:$0xff]   ;;  %v2181_v14 = vld [vmem:[%s2579_s2 + $0x30] sm:$0xff]  }
  0x2a   : > { %1940 = vmatpush3.bf16.msra.mxu0 %v2169_v39  ;;  %v2182_v15 = vld [vmem:[%s2579_s2 + $0x38] sm:$0xff]   ;;  %v2191_v37 = vld [vmem:[%s2579_s2 + $0xc0] sm:$0xff]  }
  0x2b   : > { %1894 = vmatpush3.bf16.msra.mxu1 %v2350_v19  ;;  %1941 = vmatprep.subr.bf16.mxu0 %v2170_v42 }
  0x2c   : > { %1895 = vmatprep.subr.bf16.mxu1 %v2361_v21 }
  0x2e   : > { %1942 = vmatpush3.bf16.msra.mxu0 %v2170_v42 }
  0x2f   : > { %1896 = vmatpush3.bf16.msra.mxu1 %v2361_v21  ;;  %1943 = vmatprep.subr.bf16.mxu0 %v2171_v43 }
  0x30   : > { %1897 = vmatprep.subr.bf16.mxu1 %v2368_v22 }
  0x32   : > { %1944 = vmatpush3.bf16.msra.mxu0 %v2171_v43  ;;  %v2192_v43 = vld [vmem:[%s2579_s2 + $0xc8] sm:$0xff]  }
  0x33   : > { %1898 = vmatpush3.bf16.msra.mxu1 %v2368_v22  ;;  %1945 = vmatprep.subr.bf16.mxu0 %v2172_v45 }
  0x34   : > { %1899 = vmatprep.subr.bf16.mxu1 %v2375_v23 }
  0x36   : > { %1946 = vmatpush3.bf16.msra.mxu0 %v2172_v45  ;;  %v2193_v45 = vld [vmem:[%s2579_s2 + $0xd0] sm:$0xff]  }
  0x37   : > { %1900 = vmatpush3.bf16.msra.mxu1 %v2375_v23  ;;  %1947 = vmatprep.subr.bf16.mxu0 %v2173_v46 }
  0x38   : > { %1901 = vmatprep.subr.bf16.mxu1 %v2381_v24 }
  0x3a   : > { %1948 = vmatpush3.bf16.msra.mxu0 %v2173_v46 }
  0x3b   : > { %1902 = vmatpush3.bf16.msra.mxu1 %v2381_v24  ;;  %1949 = vmatprep.subr.bf16.mxu0 %v2174_v47 }
  0x3c   : > { %1911 = vmatprep.subr.bf16.mxu1 %v2330_v16 }
  0x3e   : > { %1904 = vmatmul.mubr.bf16.vlgmr.msra.gmra.mrb[0].mxu1 %v2152_v25  ;;  %1950 = vmatpush3.bf16.msra.mxu0 %v2174_v47  ;;  %v2185_v25 = vld [vmem:[%s2579_s2 + $0x90] sm:$0xff]  }
  0x3f   : > { %1912 = vmatpush3.bf16.msra.mxu1 %v2330_v16  ;;  %1907 = vmatprep.mubr.bf16.mxu1 %v2153_v26 }
  0x40   : > { %1913 = vmatprep.subr.bf16.mxu1 %v2336_v17  ;;  %1959 = vmatprep.subr.bf16.mxu0 %v2175_v48 }
  0x43   : > { %1914 = vmatpush3.bf16.msra.mxu1 %v2336_v17 }
  0x44   : > { %1915 = vmatprep.subr.bf16.mxu1 %v2344_v18 }
  0x46   : > { %1908 = vmatmul.mubr.bf16.gmra.mrb[4].mxu1 %v2154_v27 }
  0x47   : > { %1916 = vmatpush3.bf16.msra.mxu1 %v2344_v18  ;;  %1927 = vmatprep.mubr.bf16.mxu1 %v2155_v28 }
  0x48   : > { %1917 = vmatprep.subr.bf16.mxu1 %v2350_v19 }
  0x4b   : > { %1918 = vmatpush3.bf16.msra.mxu1 %v2350_v19 }
  0x4c   : > { %1919 = vmatprep.subr.bf16.mxu1 %v2361_v21 }
  0x4f   : > { %1920 = vmatpush3.bf16.msra.mxu1 %v2361_v21 }
  0x50   : > { %1921 = vmatprep.subr.bf16.mxu1 %v2368_v22 }
  0x53   : > { %1922 = vmatpush3.bf16.msra.mxu1 %v2368_v22 }
  0x54   : > { %1923 = vmatprep.subr.bf16.mxu1 %v2375_v23 }
  0x57   : > { %1924 = vmatpush3.bf16.msra.mxu1 %v2375_v23 }
  0x58   : > { %1925 = vmatprep.subr.bf16.mxu1 %v2381_v24 }
  0x5b   : > { %1926 = vmatpush3.bf16.msra.mxu1 %v2381_v24 }
  0x5c   : > { %1983 = vmatprep.subr.bf16.mxu1 %v2330_v16 }
  0x5e   : > { %1928 = vmatmul.mubr.bf16.vlgmr.msra.gmra.mrb[8].mxu1 %v2156_v29 }
  0x5f   : > { %1931 = vmatprep.mubr.bf16.mxu1 %v2157_v30  ;;  %1984 = vmatpush3.bf16.msra.mxu1 %v2330_v16 }
  0x60   : > { %1985 = vmatprep.subr.bf16.mxu1 %v2336_v17 }
  0x63   : > { %1986 = vmatpush3.bf16.msra.mxu1 %v2336_v17 }
  0x64   : > { %1987 = vmatprep.subr.bf16.mxu1 %v2344_v18 }
  0x66   : > { %1932 = vmatmul.mubr.bf16.gmra.mrb[12].mxu1 %v2158_v31  ;;  %v2186_v31 = vld [vmem:[%s2579_s2 + $0x98] sm:$0xff]  }
  0x67   : > { %1988 = vmatpush3.bf16.msra.mxu1 %v2344_v18  ;;  %1999 = vmatprep.mubr.bf16.mxu1 %v2159_v32  ;;  %v2187_v32 = vld [vmem:[%s2579_s2 + $0xa0] sm:$0xff]  }
  0x68   : > { %1989 = vmatprep.subr.bf16.mxu1 %v2350_v19 }
  0x6b   : > { %1990 = vmatpush3.bf16.msra.mxu1 %v2350_v19 }
  0x6c   : > { %1991 = vmatprep.subr.bf16.mxu1 %v2361_v21 }
  0x6f   : > { %1992 = vmatpush3.bf16.msra.mxu1 %v2361_v21 }
  0x70   : > { %1993 = vmatprep.subr.bf16.mxu1 %v2368_v22 }
  0x73   : > { %1994 = vmatpush3.bf16.msra.mxu1 %v2368_v22 }
  0x74   : > { %1995 = vmatprep.subr.bf16.mxu1 %v2375_v23 }
  0x77   : > { %1996 = vmatpush3.bf16.msra.mxu1 %v2375_v23 }
  0x78   : > { %1997 = vmatprep.subr.bf16.mxu1 %v2381_v24 }
  0x7b   : > { %1998 = vmatpush3.bf16.msra.mxu1 %v2381_v24 }
  0x7c   : > { %2031 = vmatprep.subr.bf16.mxu1 %v2330_v16 }
  0x7e   : > { %2000 = vmatmul.mubr.bf16.vlgmr.msra.gmra.mrb[16].mxu1 %v2160_v33  ;;  %v2188_v33 = vld [vmem:[%s2579_s2 + $0xa8] sm:$0xff]  }
  0x7f   : > { %2032 = vmatpush3.bf16.msra.mxu1 %v2330_v16  ;;  %2003 = vmatprep.mubr.bf16.mxu1 %v2161_v34  ;;  %v2189_v34 = vld [vmem:[%s2579_s2 + $0xb0] sm:$0xff]  }
  0x80   : > { %2033 = vmatprep.subr.bf16.mxu1 %v2336_v17 }
  0x83   : > { %2034 = vmatpush3.bf16.msra.mxu1 %v2336_v17  ;;  %v2183_v17 = vld [vmem:[%s2579_s2 + $0x80] sm:$0xff]  }
  0x84   : > { %2035 = vmatprep.subr.bf16.mxu1 %v2344_v18 }
  0x86   : > { %2004 = vmatmul.mubr.bf16.gmra.mrb[20].mxu1 %v2162_v35  ;;  %v2190_v35 = vld [vmem:[%s2579_s2 + $0xb8] sm:$0xff]  }
  0x87   : > { %2036 = vmatpush3.bf16.msra.mxu1 %v2344_v18  ;;  %2047 = vmatprep.mubr.bf16.mxu1 %v2163_v36 }
  0x88   : > { %2037 = vmatprep.subr.bf16.mxu1 %v2350_v19 }
  0x8b   : > { %2038 = vmatpush3.bf16.msra.mxu1 %v2350_v19 }
  0x8c   : > { %2039 = vmatprep.subr.bf16.mxu1 %v2361_v21 }
  0x8f   : > { %2040 = vmatpush3.bf16.msra.mxu1 %v2361_v21 }
  0x90   : > { %2041 = vmatprep.subr.bf16.mxu1 %v2368_v22 }
  0x93   : > { %2042 = vmatpush3.bf16.msra.mxu1 %v2368_v22 }
  0x94   : > { %2043 = vmatprep.subr.bf16.mxu1 %v2375_v23 }
  0x97   : > { %2044 = vmatpush3.bf16.msra.mxu1 %v2375_v23  ;;  %v2184_v23 = vld [vmem:[%s2579_s2 + $0x88] sm:$0xff]  }
  0x98   : > { %2045 = vmatprep.subr.bf16.mxu1 %v2381_v24 }
  0x9b   : > { %2046 = vmatpush3.bf16.msra.mxu1 %v2381_v24 }
  0x9e   : > { %2048 = vmatmul.mubr.bf16.vlgmr.msra.gmra.mrb[24].mxu1 %v2164_v40 }
  0x9f   : > { %2051 = vmatprep.mubr.bf16.mxu1 %v2165_v41 }
  0xa6   : > { %2052 = vmatmul.mubr.bf16.gmra.mrb[28].mxu1 %v2166_v44 }
 0x111   : > { %v1905_v49 = vpop.f32.mrb[0].mxu1 }
 0x112   : > { %v546_v50 = vpop.f32.mrb[1].mxu1 }
 0x113   : > { %v1906_v51 = vpop.f32.mrb[2].mxu1 }
 0x114   : > { %v578_v52 = vpack.c.bf16 %v1906_v51, %v1905_v49  ;;  %v549_v53 = vpop.f32.mrb[3].mxu1  ;;  %v2194_v51 = vld [vmem:[%s2579_s2 + $0xd8] sm:$0xff]  }
 0x115   : > { %v577_v54 = vpack.c.bf16 %v549_v53, %v546_v50  ;;  %v2196_v53 = vld [vmem:[%s2579_s2 + $0xe8] sm:$0xff]  }
 0x119   : > { %v2477_v55 = vpop.f32.mrb[4].mxu1 }
 0x11a   : > { %v562_v56 = vpop.f32.mrb[5].mxu1 }
 0x11b   : > { %v2479_v57 = vpop.f32.mrb[6].mxu1 }
 0x11c   : > { %v580_v58 = vpack.c.bf16 %v2479_v57, %v2477_v55  ;;  %v565_v59 = vpop.f32.mrb[7].mxu1  ;;  %v2198_v55 = vld [vmem:[%s2579_s2 + $0xf8] sm:$0xff]  }
 0x11d   : > { %v579_v60 = vpack.c.bf16 %v565_v59, %v562_v56  ;;  %v1748_v56 = vld [vmem:[%s2580_s3] ss:$0 sm:$0xff] }
 0x131   : > { %v1929_v61 = vpop.f32.mrb[8].mxu1 }
 0x132   : > { %v664_v62 = vpop.f32.mrb[9].mxu1 }
 0x133   : > { %v1930_v63 = vpop.f32.mrb[10].mxu1 }
 0x134   : > { %v696_v0 = vpack.c.bf16 %v1930_v63, %v1929_v61  ;;  %v667_v1 = vpop.f32.mrb[11].mxu1 }
 0x135   : > { %v695_v2 = vpack.c.bf16 %v667_v1, %v664_v62 }
 0x137   : > { %1951 = vmatprep.mubr.bf16.mxu0 %v695_v2 }
 0x138   : > { %1952 = vmatmul.mubr.bf16.vlgmr.msra.gmra.mrb[0].mxu0 %v696_v0 }
 0x139   : > { %1960 = vmatpush3.bf16.msra.mxu0 %v2175_v48  ;;  %v1933_v4 = vpop.f32.mrb[12].mxu1 }
 0x13a   : > { %v680_v5 = vpop.f32.mrb[13].mxu1  ;;  %1961 = vmatprep.subr.bf16.mxu0 %v2176_v3 }
 0x13b   : > { %v1934_v7 = vpop.f32.mrb[14].mxu1 }
 0x13c   : > { %v698_v8 = vpack.c.bf16 %v1934_v7, %v1933_v4  ;;  %v683_v9 = vpop.f32.mrb[15].mxu1 }
 0x13d   : > { %v697_v10 = vpack.c.bf16 %v683_v9, %v680_v5  ;;  %1962 = vmatpush3.bf16.msra.mxu0 %v2176_v3 }
 0x13e   : > { %1963 = vmatprep.subr.bf16.mxu0 %v2177_v6 }
 0x13f   : > { %1955 = vmatprep.mubr.bf16.mxu0 %v697_v10 }
 0x140   : > { %1956 = vmatmul.mubr.bf16.gmra.mrb[4].mxu0 %v698_v8 }
 0x141   : > { %1964 = vmatpush3.bf16.msra.mxu0 %v2177_v6  ;;  %1975 = vmatprep.mubr.bf16.mxu0 %v577_v54  ;;  %v2197_v54 = vld [vmem:[%s2579_s2 + $0xf0] sm:$0xff]  }
 0x142   : > { %1965 = vmatprep.subr.bf16.mxu0 %v2178_v11 }
 0x145   : > { %1966 = vmatpush3.bf16.msra.mxu0 %v2178_v11 }
 0x146   : > { %1967 = vmatprep.subr.bf16.mxu0 %v2179_v12 }
 0x149   : > { %1968 = vmatpush3.bf16.msra.mxu0 %v2179_v12 }
 0x14a   : > { %1969 = vmatprep.subr.bf16.mxu0 %v2180_v13 }
 0x14d   : > { %1970 = vmatpush3.bf16.msra.mxu0 %v2180_v13 }
 0x14e   : > { %1971 = vmatprep.subr.bf16.mxu0 %v2181_v14 }
 0x151   : > { %1972 = vmatpush3.bf16.msra.mxu0 %v2181_v14  ;;  %v2001_v16 = vpop.f32.mrb[16].mxu1 }
 0x152   : > { %1973 = vmatprep.subr.bf16.mxu0 %v2182_v15  ;;  %v1009_v18 = vpop.f32.mrb[17].mxu1 }
 0x153   : > { %v2002_v19 = vpop.f32.mrb[18].mxu1 }
 0x154   : > { %v1041_v20 = vpack.c.bf16 %v2002_v19, %v2001_v16  ;;  %v1012_v21 = vpop.f32.mrb[19].mxu1 }
 0x155   : > { %1974 = vmatpush3.bf16.msra.mxu0 %v2182_v15  ;;  %v1040_v22 = vpack.c.bf16 %v1012_v21, %v1009_v18 }
 0x156   : > { %2007 = vmatprep.subr.bf16.mxu0 %v2183_v17 }
 0x158   : > { %1976 = vmatmul.mubr.bf16.vlgmr.msra.gmra.mrb[0].mxu0 %v578_v52  ;;  %v2195_v52 = vld [vmem:[%s2579_s2 + $0xe0] sm:$0xff]  }
 0x159   : > { %1979 = vmatprep.mubr.bf16.mxu0 %v579_v60  ;;  %2008 = vmatpush3.bf16.msra.mxu0 %v2183_v17  ;;  %v2005_v24 = vpop.f32.mrb[20].mxu1 }
 0x15a   : > { %2009 = vmatprep.subr.bf16.mxu0 %v2184_v23  ;;  %v1025_v26 = vpop.f32.mrb[21].mxu1 }
 0x15b   : > { %v2006_v27 = vpop.f32.mrb[22].mxu1 }
 0x15c   : > { %v1043_v28 = vpack.c.bf16 %v2006_v27, %v2005_v24  ;;  %v1028_v29 = vpop.f32.mrb[23].mxu1 }
 0x15d   : > { %2010 = vmatpush3.bf16.msra.mxu0 %v2184_v23  ;;  %v1042_v30 = vpack.c.bf16 %v1028_v29, %v1025_v26 }
 0x15e   : > { %2011 = vmatprep.subr.bf16.mxu0 %v2185_v25 }
 0x160   : > { %1980 = vmatmul.mubr.bf16.gmra.mrb[4].mxu0 %v580_v58 }
 0x161   : > { %2012 = vmatpush3.bf16.msra.mxu0 %v2185_v25  ;;  %2023 = vmatprep.mubr.bf16.mxu0 %v1040_v22 }
 0x162   : > { %2013 = vmatprep.subr.bf16.mxu0 %v2186_v31 }
 0x165   : > { %2014 = vmatpush3.bf16.msra.mxu0 %v2186_v31 }
 0x166   : > { %2015 = vmatprep.subr.bf16.mxu0 %v2187_v32 }
 0x169   : > { %2016 = vmatpush3.bf16.msra.mxu0 %v2187_v32 }
 0x16a   : > { %2017 = vmatprep.subr.bf16.mxu0 %v2188_v33 }
 0x16d   : > { %2018 = vmatpush3.bf16.msra.mxu0 %v2188_v33 }
 0x16e   : > { %2019 = vmatprep.subr.bf16.mxu0 %v2189_v34 }
 0x171   : > { %2020 = vmatpush3.bf16.msra.mxu0 %v2189_v34  ;;  %v2049_v36 = vpop.f32.mrb[24].mxu1 }
 0x172   : > { %2021 = vmatprep.subr.bf16.mxu0 %v2190_v35  ;;  %v1249_v38 = vpop.f32.mrb[25].mxu1 }
 0x173   : > { %v2050_v39 = vpop.f32.mrb[26].mxu1 }
 0x174   : > { %v1281_v40 = vpack.c.bf16 %v2050_v39, %v2049_v36  ;;  %v1252_v41 = vpop.f32.mrb[27].mxu1 }
 0x175   : > { %2022 = vmatpush3.bf16.msra.mxu0 %v2190_v35  ;;  %v1280_v42 = vpack.c.bf16 %v1252_v41, %v1249_v38 }
 0x176   : > { %2055 = vmatprep.subr.bf16.mxu0 %v2191_v37 }
 0x178   : > { %2024 = vmatmul.mubr.bf16.vlgmr.msra.gmra.mrb[0].mxu0 %v1041_v20 }
 0x179   : > { %2056 = vmatpush3.bf16.msra.mxu0 %v2191_v37  ;;  %2027 = vmatprep.mubr.bf16.mxu0 %v1042_v30  ;;  %v2053_v44 = vpop.f32.mrb[28].mxu1 }
 0x17a   : > { %2057 = vmatprep.subr.bf16.mxu0 %v2192_v43  ;;  %v1265_v46 = vpop.f32.mrb[29].mxu1 }
 0x17b   : > { %v2054_v47 = vpop.f32.mrb[30].mxu1 }
 0x17c   : > { %v1283_v48 = vpack.c.bf16 %v2054_v47, %v2053_v44  ;;  %v1268_v49 = vpop.f32.mrb[31].mxu1 }
 0x17d   : > { %2058 = vmatpush3.bf16.msra.mxu0 %v2192_v43  ;;  %v1282_v50 = vpack.c.bf16 %v1268_v49, %v1265_v46 }
 0x17e   : > { %2059 = vmatprep.subr.bf16.mxu0 %v2193_v45 }
 0x180   : > { %2028 = vmatmul.mubr.bf16.gmra.mrb[4].mxu0 %v1043_v28 }
 0x181   : > { %2060 = vmatpush3.bf16.msra.mxu0 %v2193_v45  ;;  %2071 = vmatprep.mubr.bf16.mxu0 %v1280_v42 }
 0x182   : > { %2061 = vmatprep.subr.bf16.mxu0 %v2194_v51 }
 0x185   : > { %2062 = vmatpush3.bf16.msra.mxu0 %v2194_v51 }
 0x186   : > { %2063 = vmatprep.subr.bf16.mxu0 %v2195_v52 }
 0x189   : > { %2064 = vmatpush3.bf16.msra.mxu0 %v2195_v52 }
 0x18a   : > { %2065 = vmatprep.subr.bf16.mxu0 %v2196_v53 }
 0x18d   : > { %2066 = vmatpush3.bf16.msra.mxu0 %v2196_v53 }
 0x18e   : > { %2067 = vmatprep.subr.bf16.mxu0 %v2197_v54 }
 0x191   : > { %2068 = vmatpush3.bf16.msra.mxu0 %v2197_v54 }
 0x192   : > { %2069 = vmatprep.subr.bf16.mxu0 %v2198_v55 }
 0x195   : > { %2070 = vmatpush3.bf16.msra.mxu0 %v2198_v55 }
 0x198   : > { %2072 = vmatmul.mubr.bf16.vlgmr.msra.gmra.mrb[0].mxu0 %v1281_v40 }
 0x199   : > { %2075 = vmatprep.mubr.bf16.mxu0 %v1282_v50 }
 0x1a0   : > { %2076 = vmatmul.mubr.bf16.gmra.mrb[4].mxu0 %v1283_v48 }
 0x26b   : > { %v2073_v57 = vpop.f32.mrb[0].mxu0 }
 0x26c   : > { %v1466_v58 = vadd.f32 %v2073_v57, %v1748_v56  ;;  %v1383_v59 = vpop.f32.mrb[1].mxu0 }
 0x26d   : > { %v1464_v60 = vadd.f32 %v1748_v56, %v1383_v59  ;;  %v2074_v61 = vpop.f32.mrb[2].mxu0 }
 0x26e   : > { %v1467_v62 = vadd.f32 %v2074_v61, %v1748_v56  ;;  %v1386_v63 = vpop.f32.mrb[3].mxu0  ;;  %v1474_v1 = vmax.f32 %v1466_v58, 0.0 }
 0x26f   : > { %v1465_v0 = vadd.f32 %v1748_v56, %v1386_v63  ;;  %v1472_v3 = vmax.f32 %v1464_v60, 0.0 }
 0x270   : > { %v1475_v2 = vmax.f32 %v1467_v62, 0.0 }
 0x271   : > { %v1473_v4 = vmax.f32 %v1465_v0, 0.0 }
 0x272   : > { %v1776_v5 = vpack.c.bf16 %v1475_v2, %v1474_v1 }
 0x273   : > { %v1771_v6 = vpack.c.bf16 %v1473_v4, %v1472_v3  ;;  %v2077_v7 = vpop.f32.mrb[4].mxu0 }
 0x274   : > { %1788 = vst [vmem:[%s401_s13 + $0x8] sm:$0xff] %v1776_v5   ;;  %v1470_v8 = vadd.f32 %v2077_v7, %v1748_v56  ;;  %v1399_v9 = vpop.f32.mrb[5].mxu0 }
 0x275   : > { %1772 = vst [vmem:[%s401_s13] sm:$0xff] %v1771_v6   ;;  %v1468_v10 = vadd.f32 %v1748_v56, %v1399_v9  ;;  %v2078_v11 = vpop.f32.mrb[6].mxu0 }
 0x276   : > { %v1471_v12 = vadd.f32 %v2078_v11, %v1748_v56  ;;  %v1402_v13 = vpop.f32.mrb[7].mxu0  ;;  %v1478_v15 = vmax.f32 %v1470_v8, 0.0 }
 0x277   : > { %v1469_v14 = vadd.f32 %v1748_v56, %v1402_v13  ;;  %v1476_v17 = vmax.f32 %v1468_v10, 0.0 }
 0x278   : > { %v1479_v16 = vmax.f32 %v1471_v12, 0.0 }
 0x279   : > { %v1477_v18 = vmax.f32 %v1469_v14, 0.0 }
 0x27a   : > { %v1786_v19 = vpack.c.bf16 %v1479_v16, %v1478_v15 }
 0x27b   : > { %v1781_v20 = vpack.c.bf16 %v1477_v18, %v1476_v17 }
 0x27c   : > { %1790 = vst [vmem:[%s401_s13 + $0x18] sm:$0xff] %v1786_v19  }
 0x27d   : > { %1789 = vst [vmem:[%s401_s13 + $0x10] sm:$0xff] %v1781_v20  }
 0x27e PF: > { %s14_s19 = sadd.s32 1, %s2237_s19   ;;  %s2582_s15 = smov %s2225_s16 }
 0x27f   : > { %p11_p10 = scmp.ge.s32.totalorder %s14_s19, 4   ;;  %s2583_s16 = smov %s2299_s23 }
 0x280   : > { %s2584_s17 = smov %s2233_s18  ;;  %s2585_s18 = smov %s2587_s20 }
 0x281   :  { %13 = sbr.rel (!%p11_p10) target bundleno = 3 (0x3), region = 129 }

</bundles_post_ra>
